<compile_context>
chip_gen: v5e
topology: v5e:2x2
jax: 0.10.0
libtpu: 0.0.40
codegen_flags: <defaults>
</compile_context>

<pallas_src>
import functools

import jax
import jax.numpy as jnp
import numpy as np
from jax.experimental import pallas as pl
from jax.experimental.pallas import tpu as pltpu

CPAD = 128     # padded channel count == TPU lane width
_WPAD = 8      # sublane-aligned offset used for the left spatial zero padding


def _fused_stem_kernel(x_ref, w1_ref, w2_ref, w3_ref,
                       s1_ref, b1_ref, s2_ref, b2_ref, s3_ref, b3_ref,
                       o_ref,
                       pad1_ref, pad2_ref, patch2_ref,
                       *, hs, ws, c1):
    """One batch image per grid step.  conv1 (3x3/s2 == s2d 2x2/s1) -> conv2
    (3x3/s1, single im2col matmul) -> conv3 (1x1), each + folded BN + ReLU6.
    All intermediates stay in VMEM."""
    f32 = jnp.float32
    m = hs * ws
    cdt = x_ref.dtype

    # -------- layer 1: 2x2 stride-1 conv over the space-to-depth input ---------
    # Zero-pad one block-row on top / one block-col on the left by writing the
    # tile into the interior of a zeroed VMEM scratch (aligned stores only:
    # leading-dim offset 1, sublane offset 8).
    pad1_ref[...] = jnp.zeros(pad1_ref.shape, cdt)
    pad1_ref[1:hs + 1, _WPAD:_WPAD + ws, :] = x_ref[...].reshape(hs, ws, c1)

    acc = jnp.zeros((m, CPAD), f32)
    for bh in range(2):
        for bw in range(2):
            t = bh * 2 + bw
            tap = pad1_ref[bh:bh + hs, _WPAD - 1 + bw:_WPAD - 1 + bw + ws, :]
            acc = acc + jnp.dot(tap.reshape(m, c1),
                                w1_ref[t * c1:(t + 1) * c1, :],
                                preferred_element_type=f32)
    y = jnp.clip(acc * s1_ref[...] + b1_ref[...], 0.0, 6.0)        # (m, 128) f32

    # -------- layer 2: 3x3 stride-1 conv as ONE im2col matmul ------------------
    pad2_ref[...] = jnp.zeros(pad2_ref.shape, cdt)
    pad2_ref[1:hs + 1, _WPAD:_WPAD + ws, :] = y.astype(cdt).reshape(hs, ws, CPAD)
    for kh in range(3):
        for kw in range(3):
            t = kh * 3 + kw
            tap = pad2_ref[kh:kh + hs, _WPAD - 1 + kw:_WPAD - 1 + kw + ws, :]
            patch2_ref[:, t * CPAD:(t + 1) * CPAD] = tap.reshape(m, CPAD)
    y = jnp.dot(patch2_ref[...], w2_ref[...], preferred_element_type=f32)
    y = jnp.clip(y * s2_ref[...] + b2_ref[...], 0.0, 6.0)

    # -------- layer 3: 1x1 conv == plain matmul --------------------------------
    y = jnp.dot(y.astype(cdt), w3_ref[...], preferred_element_type=f32)
    y = jnp.clip(y * s3_ref[...] + b3_ref[...], 0.0, 6.0)

    o_ref[...] = y.reshape(1, hs, ws, CPAD).astype(o_ref.dtype)    # lane-dense store


def _space_to_depth(x_nhwc):
    """(N, H, W, C) -> (N, H/2, W/2, 4C), channel order (sub_r, sub_c, c)."""
    n, h, w, c = x_nhwc.shape
    x = x_nhwc.reshape(n, h // 2, 2, w // 2, 2, c)
    x = jnp.transpose(x, (0, 1, 3, 2, 4, 5))
    return x.reshape(n, h // 2, w // 2, 4 * c)


def _prep_weights(p, cin, cout, compute_dtype):
    """Host-side (tiny) weight rearrangement + channel padding to 128."""
    # conv1: 3x3 stride-2 -> equivalent 2x2 stride-1 kernel over the s2d input:
    #   w1_mat[(bh*2+bw)*4cin + sub_r*2cin + sub_c*cin + ci, co]
    #     = w1[2bh+sub_r-1, 2bw+sub_c-1, ci, co]   (zero when kh/kw == -1)
    w1 = p['w1']                                               # (3,3,cin,cout) HWIO
    w1p = jnp.pad(w1, ((1, 0), (1, 0), (0, 0), (0, 0)))        # (4,4,cin,cout)
    w1m = w1p.reshape(2, 2, 2, 2, cin, cout)                   # (bh,sub_r,bw,sub_c,ci,co)
    w1m = jnp.transpose(w1m, (0, 2, 1, 3, 4, 5)).reshape(16 * cin, cout)
    w1m = jnp.pad(w1m, ((0, 0), (0, CPAD - cout)))

    # conv2: 3x3 im2col matrix with in/out channels padded to 128.
    w2p = jnp.pad(p['w2'], ((0, 0), (0, 0), (0, CPAD - cout), (0, CPAD - cout)))
    w2m = w2p.reshape(9 * CPAD, CPAD)

    # conv3: 1x1.
    w3m = jnp.pad(p['w3'][0, 0], ((0, CPAD - cout), (0, CPAD - cout)))

    def vec(v):  # padded channels get scale=0 / bias=0 -> stay exactly 0
        return jnp.pad(v, (0, CPAD - cout)).reshape(1, CPAD).astype(jnp.float32)

    mats = tuple(w.astype(compute_dtype) for w in (w1m, w2m, w3m))
    vecs = (vec(p['s1']), vec(p['b1']), vec(p['s2']), vec(p['b2']),
            vec(p['s3']), vec(p['b3']))
    return mats, vecs


def cnn_stem_2(x_nchw, p, *, compute_dtype=jnp.float32):
    """Matches CNN_Stem_2.forward; NCHW in / NCHW out like PyTorch."""
    n, cin, h, w = x_nchw.shape
    cout = p['w1'].shape[-1]
    assert h % 2 == 0 and w % 2 == 0, "stride-2 stem expects even spatial dims"
    hs, ws, c1 = h // 2, w // 2, 4 * cin

    x = jnp.transpose(x_nchw, (0, 2, 3, 1))                    # NCHW -> NHWC
    x = _space_to_depth(x).astype(compute_dtype)               # (n, hs, ws, 4*cin)
    (w1m, w2m, w3m), vecs = _prep_weights(p, cin, cout, compute_dtype)

    kern = functools.partial(_fused_stem_kernel, hs=hs, ws=ws, c1=c1)
    vec_spec = pl.BlockSpec((1, CPAD), lambda i: (0, 0))

    def full2d(a):
        return pl.BlockSpec(a.shape, lambda i: (0, 0))

    out = pl.pallas_call(
        kern,
        out_shape=jax.ShapeDtypeStruct((n, hs, ws, CPAD), jnp.float32),
        grid=(n,),
        in_specs=[
            pl.BlockSpec((1, hs, ws, c1), lambda i: (i, 0, 0, 0)),
            full2d(w1m), full2d(w2m), full2d(w3m),
            vec_spec, vec_spec, vec_spec, vec_spec, vec_spec, vec_spec,
        ],
        out_specs=pl.BlockSpec((1, hs, ws, CPAD), lambda i: (i, 0, 0, 0)),
        scratch_shapes=[
            pltpu.VMEM((hs + 1, ws + _WPAD, c1), compute_dtype),        # padded s2d input
            pltpu.VMEM((hs + 2, ws + 2 * _WPAD, CPAD), compute_dtype),  # padded layer-1 out
            pltpu.VMEM((hs * ws, 9 * CPAD), compute_dtype),             # layer-2 im2col
        ],
        compiler_params=pltpu.CompilerParams(
            dimension_semantics=("parallel",),        # batch axis -> both TCs on v7x
            vmem_limit_bytes=32 * 1024 * 1024),
    )(x, w1m, w2m, w3m, *vecs)

    out = out[..., :cout]                                      # drop padded channels
    return jnp.transpose(out, (0, 3, 1, 2))                    # NHWC -> NCHW


# ------------------------------ test plumbing ---------------------------------

def _fold_bn(kg, kb, km, kv, c, eps=1e-5):
    gamma = 1.0 + 0.1 * jax.random.normal(kg, (c,), jnp.float32)
    beta = 0.1 * jax.random.normal(kb, (c,), jnp.float32)
    mean = 0.05 * jax.random.normal(km, (c,), jnp.float32)
    var = jnp.abs(jax.random.normal(kv, (c,), jnp.float32)) + 0.5
    scale = gamma / jnp.sqrt(var + eps)
    bias = beta - mean * scale
    return scale, bias


def init_params(key, in_channels, out_channels):
    ks = jax.random.split(key, 15)
    p = {}
    p['w1'] = 0.2 * jax.random.normal(ks[0], (3, 3, in_channels, out_channels),
                                      jnp.float32)
    p['s1'], p['b1'] = _fold_bn(ks[1], ks[2], ks[3], ks[4], out_channels)
    p['w2'] = 0.2 * jax.random.normal(ks[5], (3, 3, out_channels, out_channels),
                                      jnp.float32)
    p['s2'], p['b2'] = _fold_bn(ks[6], ks[7], ks[8], ks[9], out_channels)
    p['w3'] = 0.2 * jax.random.normal(ks[10], (1, 1, out_channels, out_channels),
                                      jnp.float32)
    p['s3'], p['b3'] = _fold_bn(ks[11], ks[12], ks[13], ks[14], out_channels)
    return p


def reference(x_nchw, p):
    """Pure-JAX reference (XLA conv) for the correctness check."""
    def block(x, w, s, b, stride, pad):
        y = jax.lax.conv_general_dilated(
            x, w, (stride, stride), [(pad, pad), (pad, pad)],
            dimension_numbers=('NHWC', 'HWIO', 'NHWC'))
        y = y * s.reshape(1, 1, 1, -1) + b.reshape(1, 1, 1, -1)
        return jnp.clip(y, 0.0, 6.0)

    x = jnp.transpose(x_nchw, (0, 2, 3, 1))
    x = block(x, p['w1'], p['s1'], p['b1'], 2, 1)
    x = block(x, p['w2'], p['s2'], p['b2'], 1, 1)
    x = block(x, p['w3'], p['s3'], p['b3'], 1, 0)
    return jnp.transpose(x, (0, 3, 1, 2))


if __name__ == "__main__":
    key = jax.random.PRNGKey(0)
    k_x, k_p = jax.random.split(key)

    N, C_IN, H, W = 2, 4, 16, 16
    C_OUT = 8

    x = jax.random.normal(k_x, (N, C_IN, H, W), jnp.float32)   # NCHW like torch
    params = init_params(k_p, C_IN, C_OUT)

    out = jax.block_until_ready(cnn_stem_2(x, params))          # f32 path (use
    ref = jax.block_until_ready(reference(x, params))           # bf16 on v6e/v7x)

    assert out.shape == (N, C_OUT, H // 2, W // 2), out.shape
    np.testing.assert_allclose(np.asarray(out), np.asarray(ref),
                               rtol=1e-4, atol=1e-4)
    print("KERNEL_OK")
</pallas_src>

<mosaic_0001>
module attributes {stable_mosaic.version = 11 : i64} {
  func.func @_fused_stem_kernel(%arg0: i32, %arg1: memref<1x8x8x16xf32, #tpu.memory_space<vmem>>, %arg2: memref<64x128xf32, #tpu.memory_space<vmem>>, %arg3: memref<1152x128xf32, #tpu.memory_space<vmem>>, %arg4: memref<128x128xf32, #tpu.memory_space<vmem>>, %arg5: memref<1x128xf32, #tpu.memory_space<vmem>>, %arg6: memref<1x128xf32, #tpu.memory_space<vmem>>, %arg7: memref<1x128xf32, #tpu.memory_space<vmem>>, %arg8: memref<1x128xf32, #tpu.memory_space<vmem>>, %arg9: memref<1x128xf32, #tpu.memory_space<vmem>>, %arg10: memref<1x128xf32, #tpu.memory_space<vmem>>, %arg11: memref<1x8x8x128xf32, #tpu.memory_space<vmem>>, %arg12: memref<9x16x16xf32, #tpu.memory_space<vmem>>, %arg13: memref<10x24x128xf32, #tpu.memory_space<vmem>>, %arg14: memref<64x1152xf32, #tpu.memory_space<vmem>>) attributes {dimension_semantics = [#tpu.dimension_semantics<parallel>], iteration_bounds = array<i64: 2>, scalar_prefetch = 0 : i64, scratch_operands = 3 : i64, tpu.core_type = #tpu.core_type<tc>, window_params = [{transform_indices = @transform_0, window_bounds = array<i64: 1, 8, 8, 16>}, {pipeline_mode = #tpu.pipeline_mode<synchronous>, transform_indices = @transform_1, window_bounds = array<i64: 64, 128>}, {pipeline_mode = #tpu.pipeline_mode<synchronous>, transform_indices = @transform_2, window_bounds = array<i64: 1152, 128>}, {pipeline_mode = #tpu.pipeline_mode<synchronous>, transform_indices = @transform_3, window_bounds = array<i64: 128, 128>}, {pipeline_mode = #tpu.pipeline_mode<synchronous>, transform_indices = @transform_4, window_bounds = array<i64: 1, 128>}, {pipeline_mode = #tpu.pipeline_mode<synchronous>, transform_indices = @transform_5, window_bounds = array<i64: 1, 128>}, {pipeline_mode = #tpu.pipeline_mode<synchronous>, transform_indices = @transform_6, window_bounds = array<i64: 1, 128>}, {pipeline_mode = #tpu.pipeline_mode<synchronous>, transform_indices = @transform_7, window_bounds = array<i64: 1, 128>}, {pipeline_mode = #tpu.pipeline_mode<synchronous>, transform_indices = @transform_8, window_bounds = array<i64: 1, 128>}, {pipeline_mode = #tpu.pipeline_mode<synchronous>, transform_indices = @transform_9, window_bounds = array<i64: 1, 128>}, {transform_indices = @transform_10, window_bounds = array<i64: 1, 8, 8, 128>}]} {
    %cst = arith.constant 0.000000e+00 : f32
    %0 = vector.broadcast %cst : f32 to vector<9x16x16xf32>
    %c0 = arith.constant 0 : index
    %c0_0 = arith.constant 0 : index
    %c0_1 = arith.constant 0 : index
    %1 = vector.load %arg12[%c0, %c0_0, %c0_1] : memref<9x16x16xf32, #tpu.memory_space<vmem>>, vector<9x16x16xf32>
    tpu.vector_store %arg12[%c0, %c0_0, %c0_1], %0 {strides = array<i32>} : memref<9x16x16xf32, #tpu.memory_space<vmem>>, vector<9x16x16xf32>,
    %c0_2 = arith.constant 0 : index
    %c0_3 = arith.constant 0 : index
    %c0_4 = arith.constant 0 : index
    %c0_5 = arith.constant 0 : index
    %2 = vector.load %arg1[%c0_2, %c0_3, %c0_4, %c0_5] : memref<1x8x8x16xf32, #tpu.memory_space<vmem>>, vector<1x8x8x16xf32>
    %3 = vector.shape_cast %2 : vector<1x8x8x16xf32> to vector<8x8x16xf32>
    %c1 = arith.constant 1 : index
    %c8 = arith.constant 8 : index
    %c0_6 = arith.constant 0 : index
    %4 = vector.load %arg12[%c1, %c8, %c0_6] : memref<9x16x16xf32, #tpu.memory_space<vmem>>, vector<8x8x16xf32>
    tpu.vector_store %arg12[%c1, %c8, %c0_6], %3 {strides = array<i32>} : memref<9x16x16xf32, #tpu.memory_space<vmem>>, vector<8x8x16xf32>,
    %cst_7 = arith.constant 0.000000e+00 : f32
    %5 = vector.broadcast %cst_7 : f32 to vector<64x128xf32>
    %c0_8 = arith.constant 0 : index
    %c7 = arith.constant 7 : index
    %c0_9 = arith.constant 0 : index
    %6 = vector.load %arg12[%c0_8, %c7, %c0_9] : memref<9x16x16xf32, #tpu.memory_space<vmem>>, vector<8x8x16xf32>
    %7 = vector.shape_cast %6 : vector<8x8x16xf32> to vector<64x16xf32>
    %c0_10 = arith.constant 0 : index
    %c0_11 = arith.constant 0 : index
    %8 = vector.load %arg2[%c0_10, %c0_11] : memref<64x128xf32, #tpu.memory_space<vmem>>, vector<16x128xf32>
    %cst_12 = arith.constant dense<0.000000e+00> : vector<64x128xf32>
    %9 = tpu.matmul %7, %8, %cst_12 {dimension_numbers = #tpu.dot_dimension_numbers<[1], [0], [0], [1], [0, 0, 1, 1], [], []>} : vector<64x16xf32>, vector<16x128xf32>, vector<64x128xf32> -> vector<64x128xf32>
    %10 = arith.addf %5, %9 : vector<64x128xf32>
    %c0_13 = arith.constant 0 : index
    %c8_14 = arith.constant 8 : index
    %c0_15 = arith.constant 0 : index
    %11 = vector.load %arg12[%c0_13, %c8_14, %c0_15] : memref<9x16x16xf32, #tpu.memory_space<vmem>>, vector<8x8x16xf32>
    %12 = vector.shape_cast %11 : vector<8x8x16xf32> to vector<64x16xf32>
    %c16 = arith.constant 16 : index
    %c0_16 = arith.constant 0 : index
    %13 = vector.load %arg2[%c16, %c0_16] : memref<64x128xf32, #tpu.memory_space<vmem>>, vector<16x128xf32>
    %cst_17 = arith.constant dense<0.000000e+00> : vector<64x128xf32>
    %14 = tpu.matmul %12, %13, %cst_17 {dimension_numbers = #tpu.dot_dimension_numbers<[1], [0], [0], [1], [0, 0, 1, 1], [], []>} : vector<64x16xf32>, vector<16x128xf32>, vector<64x128xf32> -> vector<64x128xf32>
    %15 = arith.addf %10, %14 : vector<64x128xf32>
    %c1_18 = arith.constant 1 : index
    %c7_19 = arith.constant 7 : index
    %c0_20 = arith.constant 0 : index
    %16 = vector.load %arg12[%c1_18, %c7_19, %c0_20] : memref<9x16x16xf32, #tpu.memory_space<vmem>>, vector<8x8x16xf32>
    %17 = vector.shape_cast %16 : vector<8x8x16xf32> to vector<64x16xf32>
    %c32 = arith.constant 32 : index
    %c0_21 = arith.constant 0 : index
    %18 = vector.load %arg2[%c32, %c0_21] : memref<64x128xf32, #tpu.memory_space<vmem>>, vector<16x128xf32>
    %cst_22 = arith.constant dense<0.000000e+00> : vector<64x128xf32>
    %19 = tpu.matmul %17, %18, %cst_22 {dimension_numbers = #tpu.dot_dimension_numbers<[1], [0], [0], [1], [0, 0, 1, 1], [], []>} : vector<64x16xf32>, vector<16x128xf32>, vector<64x128xf32> -> vector<64x128xf32>
    %20 = arith.addf %15, %19 : vector<64x128xf32>
    %c1_23 = arith.constant 1 : index
    %c8_24 = arith.constant 8 : index
    %c0_25 = arith.constant 0 : index
    %21 = vector.load %arg12[%c1_23, %c8_24, %c0_25] : memref<9x16x16xf32, #tpu.memory_space<vmem>>, vector<8x8x16xf32>
    %22 = vector.shape_cast %21 : vector<8x8x16xf32> to vector<64x16xf32>
    %c48 = arith.constant 48 : index
    %c0_26 = arith.constant 0 : index
    %23 = vector.load %arg2[%c48, %c0_26] : memref<64x128xf32, #tpu.memory_space<vmem>>, vector<16x128xf32>
    %cst_27 = arith.constant dense<0.000000e+00> : vector<64x128xf32>
    %24 = tpu.matmul %22, %23, %cst_27 {dimension_numbers = #tpu.dot_dimension_numbers<[1], [0], [0], [1], [0, 0, 1, 1], [], []>} : vector<64x16xf32>, vector<16x128xf32>, vector<64x128xf32> -> vector<64x128xf32>
    %25 = arith.addf %20, %24 : vector<64x128xf32>
    %c0_28 = arith.constant 0 : index
    %c0_29 = arith.constant 0 : index
    %26 = vector.load %arg5[%c0_28, %c0_29] : memref<1x128xf32, #tpu.memory_space<vmem>>, vector<1x128xf32>
    %27 = vector.broadcast %26 : vector<1x128xf32> to vector<64x128xf32>
    %28 = arith.mulf %25, %27 : vector<64x128xf32>
    %c0_30 = arith.constant 0 : index
    %c0_31 = arith.constant 0 : index
    %29 = vector.load %arg6[%c0_30, %c0_31] : memref<1x128xf32, #tpu.memory_space<vmem>>, vector<1x128xf32>
    %30 = vector.broadcast %29 : vector<1x128xf32> to vector<64x128xf32>
    %31 = arith.addf %28, %30 : vector<64x128xf32>
    %cst_32 = arith.constant 0.000000e+00 : f32
    %cst_33 = arith.constant 6.000000e+00 : f32
    %32 = vector.broadcast %cst_32 : f32 to vector<64x128xf32>
    %33 = arith.maximumf %32, %31 : vector<64x128xf32>
    %34 = vector.broadcast %cst_33 : f32 to vector<64x128xf32>
    %35 = arith.minimumf %34, %33 : vector<64x128xf32>
    %cst_34 = arith.constant 0.000000e+00 : f32
    %36 = vector.broadcast %cst_34 : f32 to vector<10x24x128xf32>
    %c0_35 = arith.constant 0 : index
    %c0_36 = arith.constant 0 : index
    %c0_37 = arith.constant 0 : index
    %37 = vector.load %arg13[%c0_35, %c0_36, %c0_37] : memref<10x24x128xf32, #tpu.memory_space<vmem>>, vector<10x24x128xf32>
    tpu.vector_store %arg13[%c0_35, %c0_36, %c0_37], %36 {strides = array<i32>} : memref<10x24x128xf32, #tpu.memory_space<vmem>>, vector<10x24x128xf32>,
    %38 = vector.shape_cast %35 : vector<64x128xf32> to vector<8x8x128xf32>
    %c1_38 = arith.constant 1 : index
    %c8_39 = arith.constant 8 : index
    %c0_40 = arith.constant 0 : index
    %39 = vector.load %arg13[%c1_38, %c8_39, %c0_40] : memref<10x24x128xf32, #tpu.memory_space<vmem>>, vector<8x8x128xf32>
    tpu.vector_store %arg13[%c1_38, %c8_39, %c0_40], %38 {strides = array<i32>} : memref<10x24x128xf32, #tpu.memory_space<vmem>>, vector<8x8x128xf32>,
    %c0_41 = arith.constant 0 : index
    %c7_42 = arith.constant 7 : index
    %c0_43 = arith.constant 0 : index
    %40 = vector.load %arg13[%c0_41, %c7_42, %c0_43] : memref<10x24x128xf32, #tpu.memory_space<vmem>>, vector<8x8x128xf32>
    %41 = vector.shape_cast %40 : vector<8x8x128xf32> to vector<64x128xf32>
    %c0_44 = arith.constant 0 : index
    %c0_45 = arith.constant 0 : index
    %42 = vector.load %arg14[%c0_44, %c0_45] : memref<64x1152xf32, #tpu.memory_space<vmem>>, vector<64x128xf32>
    tpu.vector_store %arg14[%c0_44, %c0_45], %41 {strides = array<i32>} : memref<64x1152xf32, #tpu.memory_space<vmem>>, vector<64x128xf32>,
    %c0_46 = arith.constant 0 : index
    %c8_47 = arith.constant 8 : index
    %c0_48 = arith.constant 0 : index
    %43 = vector.load %arg13[%c0_46, %c8_47, %c0_48] : memref<10x24x128xf32, #tpu.memory_space<vmem>>, vector<8x8x128xf32>
    %44 = vector.shape_cast %43 : vector<8x8x128xf32> to vector<64x128xf32>
    %c0_49 = arith.constant 0 : index
    %c128 = arith.constant 128 : index
    %45 = vector.load %arg14[%c0_49, %c128] : memref<64x1152xf32, #tpu.memory_space<vmem>>, vector<64x128xf32>
    tpu.vector_store %arg14[%c0_49, %c128], %44 {strides = array<i32>} : memref<64x1152xf32, #tpu.memory_space<vmem>>, vector<64x128xf32>,
    %c0_50 = arith.constant 0 : index
    %c9 = arith.constant 9 : index
    %c0_51 = arith.constant 0 : index
    %46 = vector.load %arg13[%c0_50, %c9, %c0_51] : memref<10x24x128xf32, #tpu.memory_space<vmem>>, vector<8x8x128xf32>
    %47 = vector.shape_cast %46 : vector<8x8x128xf32> to vector<64x128xf32>
    %c0_52 = arith.constant 0 : index
    %c256 = arith.constant 256 : index
    %48 = vector.load %arg14[%c0_52, %c256] : memref<64x1152xf32, #tpu.memory_space<vmem>>, vector<64x128xf32>
    tpu.vector_store %arg14[%c0_52, %c256], %47 {strides = array<i32>} : memref<64x1152xf32, #tpu.memory_space<vmem>>, vector<64x128xf32>,
    %c1_53 = arith.constant 1 : index
    %c7_54 = arith.constant 7 : index
    %c0_55 = arith.constant 0 : index
    %49 = vector.load %arg13[%c1_53, %c7_54, %c0_55] : memref<10x24x128xf32, #tpu.memory_space<vmem>>, vector<8x8x128xf32>
    %50 = vector.shape_cast %49 : vector<8x8x128xf32> to vector<64x128xf32>
    %c0_56 = arith.constant 0 : index
    %c384 = arith.constant 384 : index
    %51 = vector.load %arg14[%c0_56, %c384] : memref<64x1152xf32, #tpu.memory_space<vmem>>, vector<64x128xf32>
    tpu.vector_store %arg14[%c0_56, %c384], %50 {strides = array<i32>} : memref<64x1152xf32, #tpu.memory_space<vmem>>, vector<64x128xf32>,
    %c1_57 = arith.constant 1 : index
    %c8_58 = arith.constant 8 : index
    %c0_59 = arith.constant 0 : index
    %52 = vector.load %arg13[%c1_57, %c8_58, %c0_59] : memref<10x24x128xf32, #tpu.memory_space<vmem>>, vector<8x8x128xf32>
    %53 = vector.shape_cast %52 : vector<8x8x128xf32> to vector<64x128xf32>
    %c0_60 = arith.constant 0 : index
    %c512 = arith.constant 512 : index
    %54 = vector.load %arg14[%c0_60, %c512] : memref<64x1152xf32, #tpu.memory_space<vmem>>, vector<64x128xf32>
    tpu.vector_store %arg14[%c0_60, %c512], %53 {strides = array<i32>} : memref<64x1152xf32, #tpu.memory_space<vmem>>, vector<64x128xf32>,
    %c1_61 = arith.constant 1 : index
    %c9_62 = arith.constant 9 : index
    %c0_63 = arith.constant 0 : index
    %55 = vector.load %arg13[%c1_61, %c9_62, %c0_63] : memref<10x24x128xf32, #tpu.memory_space<vmem>>, vector<8x8x128xf32>
    %56 = vector.shape_cast %55 : vector<8x8x128xf32> to vector<64x128xf32>
    %c0_64 = arith.constant 0 : index
    %c640 = arith.constant 640 : index
    %57 = vector.load %arg14[%c0_64, %c640] : memref<64x1152xf32, #tpu.memory_space<vmem>>, vector<64x128xf32>
    tpu.vector_store %arg14[%c0_64, %c640], %56 {strides = array<i32>} : memref<64x1152xf32, #tpu.memory_space<vmem>>, vector<64x128xf32>,
    %c2 = arith.constant 2 : index
    %c7_65 = arith.constant 7 : index
    %c0_66 = arith.constant 0 : index
    %58 = vector.load %arg13[%c2, %c7_65, %c0_66] : memref<10x24x128xf32, #tpu.memory_space<vmem>>, vector<8x8x128xf32>
    %59 = vector.shape_cast %58 : vector<8x8x128xf32> to vector<64x128xf32>
    %c0_67 = arith.constant 0 : index
    %c768 = arith.constant 768 : index
    %60 = vector.load %arg14[%c0_67, %c768] : memref<64x1152xf32, #tpu.memory_space<vmem>>, vector<64x128xf32>
    tpu.vector_store %arg14[%c0_67, %c768], %59 {strides = array<i32>} : memref<64x1152xf32, #tpu.memory_space<vmem>>, vector<64x128xf32>,
    %c2_68 = arith.constant 2 : index
    %c8_69 = arith.constant 8 : index
    %c0_70 = arith.constant 0 : index
    %61 = vector.load %arg13[%c2_68, %c8_69, %c0_70] : memref<10x24x128xf32, #tpu.memory_space<vmem>>, vector<8x8x128xf32>
    %62 = vector.shape_cast %61 : vector<8x8x128xf32> to vector<64x128xf32>
    %c0_71 = arith.constant 0 : index
    %c896 = arith.constant 896 : index
    %63 = vector.load %arg14[%c0_71, %c896] : memref<64x1152xf32, #tpu.memory_space<vmem>>, vector<64x128xf32>
    tpu.vector_store %arg14[%c0_71, %c896], %62 {strides = array<i32>} : memref<64x1152xf32, #tpu.memory_space<vmem>>, vector<64x128xf32>,
    %c2_72 = arith.constant 2 : index
    %c9_73 = arith.constant 9 : index
    %c0_74 = arith.constant 0 : index
    %64 = vector.load %arg13[%c2_72, %c9_73, %c0_74] : memref<10x24x128xf32, #tpu.memory_space<vmem>>, vector<8x8x128xf32>
    %65 = vector.shape_cast %64 : vector<8x8x128xf32> to vector<64x128xf32>
    %c0_75 = arith.constant 0 : index
    %c1024 = arith.constant 1024 : index
    %66 = vector.load %arg14[%c0_75, %c1024] : memref<64x1152xf32, #tpu.memory_space<vmem>>, vector<64x128xf32>
    tpu.vector_store %arg14[%c0_75, %c1024], %65 {strides = array<i32>} : memref<64x1152xf32, #tpu.memory_space<vmem>>, vector<64x128xf32>,
    %c0_76 = arith.constant 0 : index
    %c0_77 = arith.constant 0 : index
    %67 = vector.load %arg14[%c0_76, %c0_77] : memref<64x1152xf32, #tpu.memory_space<vmem>>, vector<64x1152xf32>
    %c0_78 = arith.constant 0 : index
    %c0_79 = arith.constant 0 : index
    %68 = vector.load %arg3[%c0_78, %c0_79] : memref<1152x128xf32, #tpu.memory_space<vmem>>, vector<1152x128xf32>
    %cst_80 = arith.constant dense<0.000000e+00> : vector<64x128xf32>
    %69 = tpu.matmul %67, %68, %cst_80 {dimension_numbers = #tpu.dot_dimension_numbers<[1], [0], [0], [1], [0, 0, 1, 1], [], []>} : vector<64x1152xf32>, vector<1152x128xf32>, vector<64x128xf32> -> vector<64x128xf32>
    %c0_81 = arith.constant 0 : index
    %c0_82 = arith.constant 0 : index
    %70 = vector.load %arg7[%c0_81, %c0_82] : memref<1x128xf32, #tpu.memory_space<vmem>>, vector<1x128xf32>
    %71 = vector.broadcast %70 : vector<1x128xf32> to vector<64x128xf32>
    %72 = arith.mulf %69, %71 : vector<64x128xf32>
    %c0_83 = arith.constant 0 : index
    %c0_84 = arith.constant 0 : index
    %73 = vector.load %arg8[%c0_83, %c0_84] : memref<1x128xf32, #tpu.memory_space<vmem>>, vector<1x128xf32>
    %74 = vector.broadcast %73 : vector<1x128xf32> to vector<64x128xf32>
    %75 = arith.addf %72, %74 : vector<64x128xf32>
    %cst_85 = arith.constant 0.000000e+00 : f32
    %cst_86 = arith.constant 6.000000e+00 : f32
    %76 = vector.broadcast %cst_85 : f32 to vector<64x128xf32>
    %77 = arith.maximumf %76, %75 : vector<64x128xf32>
    %78 = vector.broadcast %cst_86 : f32 to vector<64x128xf32>
    %79 = arith.minimumf %78, %77 : vector<64x128xf32>
    %c0_87 = arith.constant 0 : index
    %c0_88 = arith.constant 0 : index
    %80 = vector.load %arg4[%c0_87, %c0_88] : memref<128x128xf32, #tpu.memory_space<vmem>>, vector<128x128xf32>
    %cst_89 = arith.constant dense<0.000000e+00> : vector<64x128xf32>
    %81 = tpu.matmul %79, %80, %cst_89 {dimension_numbers = #tpu.dot_dimension_numbers<[1], [0], [0], [1], [0, 0, 1, 1], [], []>} : vector<64x128xf32>, vector<128x128xf32>, vector<64x128xf32> -> vector<64x128xf32>
    %c0_90 = arith.constant 0 : index
    %c0_91 = arith.constant 0 : index
    %82 = vector.load %arg9[%c0_90, %c0_91] : memref<1x128xf32, #tpu.memory_space<vmem>>, vector<1x128xf32>
    %83 = vector.broadcast %82 : vector<1x128xf32> to vector<64x128xf32>
    %84 = arith.mulf %81, %83 : vector<64x128xf32>
    %c0_92 = arith.constant 0 : index
    %c0_93 = arith.constant 0 : index
    %85 = vector.load %arg10[%c0_92, %c0_93] : memref<1x128xf32, #tpu.memory_space<vmem>>, vector<1x128xf32>
    %86 = vector.broadcast %85 : vector<1x128xf32> to vector<64x128xf32>
    %87 = arith.addf %84, %86 : vector<64x128xf32>
    %cst_94 = arith.constant 0.000000e+00 : f32
    %cst_95 = arith.constant 6.000000e+00 : f32
    %88 = vector.broadcast %cst_94 : f32 to vector<64x128xf32>
    %89 = arith.maximumf %88, %87 : vector<64x128xf32>
    %90 = vector.broadcast %cst_95 : f32 to vector<64x128xf32>
    %91 = arith.minimumf %90, %89 : vector<64x128xf32>
    %92 = vector.shape_cast %91 : vector<64x128xf32> to vector<1x8x8x128xf32>
    %c0_96 = arith.constant 0 : index
    %c0_97 = arith.constant 0 : index
    %c0_98 = arith.constant 0 : index
    %c0_99 = arith.constant 0 : index
    %93 = vector.load %arg11[%c0_96, %c0_97, %c0_98, %c0_99] : memref<1x8x8x128xf32, #tpu.memory_space<vmem>>, vector<1x8x8x128xf32>
    tpu.vector_store %arg11[%c0_96, %c0_97, %c0_98, %c0_99], %92 {strides = array<i32>} : memref<1x8x8x128xf32, #tpu.memory_space<vmem>>, vector<1x8x8x128xf32>,
    return
  }
  func.func @transform_0(%arg0: i32) -> (i32, i32, i32, i32) {
    %c0_i32 = arith.constant 0 : i32
    %c0_i32_0 = arith.constant 0 : i32
    %c0_i32_1 = arith.constant 0 : i32
    %c0_i32_2 = arith.constant 0 : i32
    return %arg0, %c0_i32, %c0_i32_0, %c0_i32_1 : i32, i32, i32, i32
  }
  func.func @transform_1(%arg0: i32) -> (i32, i32) {
    %c0_i32 = arith.constant 0 : i32
    %c0_i32_0 = arith.constant 0 : i32
    %c0_i32_1 = arith.constant 0 : i32
    return %c0_i32, %c0_i32_0 : i32, i32
  }
  func.func @transform_2(%arg0: i32) -> (i32, i32) {
    %c0_i32 = arith.constant 0 : i32
    %c0_i32_0 = arith.constant 0 : i32
    %c0_i32_1 = arith.constant 0 : i32
    return %c0_i32, %c0_i32_0 : i32, i32
  }
  func.func @transform_3(%arg0: i32) -> (i32, i32) {
    %c0_i32 = arith.constant 0 : i32
    %c0_i32_0 = arith.constant 0 : i32
    %c0_i32_1 = arith.constant 0 : i32
    return %c0_i32, %c0_i32_0 : i32, i32
  }
  func.func @transform_4(%arg0: i32) -> (i32, i32) {
    %c0_i32 = arith.constant 0 : i32
    %c0_i32_0 = arith.constant 0 : i32
    %c0_i32_1 = arith.constant 0 : i32
    return %c0_i32, %c0_i32_0 : i32, i32
  }
  func.func @transform_5(%arg0: i32) -> (i32, i32) {
    %c0_i32 = arith.constant 0 : i32
    %c0_i32_0 = arith.constant 0 : i32
    %c0_i32_1 = arith.constant 0 : i32
    return %c0_i32, %c0_i32_0 : i32, i32
  }
  func.func @transform_6(%arg0: i32) -> (i32, i32) {
    %c0_i32 = arith.constant 0 : i32
    %c0_i32_0 = arith.constant 0 : i32
    %c0_i32_1 = arith.constant 0 : i32
    return %c0_i32, %c0_i32_0 : i32, i32
  }
  func.func @transform_7(%arg0: i32) -> (i32, i32) {
    %c0_i32 = arith.constant 0 : i32
    %c0_i32_0 = arith.constant 0 : i32
    %c0_i32_1 = arith.constant 0 : i32
    return %c0_i32, %c0_i32_0 : i32, i32
  }
  func.func @transform_8(%arg0: i32) -> (i32, i32) {
    %c0_i32 = arith.constant 0 : i32
    %c0_i32_0 = arith.constant 0 : i32
    %c0_i32_1 = arith.constant 0 : i32
    return %c0_i32, %c0_i32_0 : i32, i32
  }
  func.func @transform_9(%arg0: i32) -> (i32, i32) {
    %c0_i32 = arith.constant 0 : i32
    %c0_i32_0 = arith.constant 0 : i32
    %c0_i32_1 = arith.constant 0 : i32
    return %c0_i32, %c0_i32_0 : i32, i32
  }
  func.func @transform_10(%arg0: i32) -> (i32, i32, i32, i32) {
    %c0_i32 = arith.constant 0 : i32
    %c0_i32_0 = arith.constant 0 : i32
    %c0_i32_1 = arith.constant 0 : i32
    %c0_i32_2 = arith.constant 0 : i32
    return %arg0, %c0_i32, %c0_i32_0, %c0_i32_1 : i32, i32, i32, i32
  }
}

</mosaic_0001>

<bundles_post_ra>
// kernel: tpu_custom_call.1
= control target key start
LH: loop header
LB: loop body
LE: loop exit
PB: predicated region body
PF: predicated region fallthrough
CT: control target
= control target key end

     0   :  { %s2850_s0 = inlined_call_operand.hbm [shape: f32[2,8,8,16], index: 0, kind: input, shape index: {}]   ;;  %s2851_s1 = inlined_call_operand.hbm [shape: f32[64,128], index: 1, kind: input, shape index: {}]   ;;  %s2852_s2 = inlined_call_operand.hbm [shape: f32[1152,128], index: 2, kind: input, shape index: {}]   ;;  %s2853_s3 = inlined_call_operand.hbm [shape: f32[128,128], index: 3, kind: input, shape index: {}]   ;;  %s2854_s4 = inlined_call_operand.vmem [shape: f32[1,128], index: 4, kind: input, shape index: {}]   ;;  %s2855_s5 = inlined_call_operand.vmem [shape: f32[1,128], index: 5, kind: input, shape index: {}]   ;;  %s2856_s6 = inlined_call_operand.vmem [shape: f32[1,128], index: 6, kind: input, shape index: {}]   ;;  %s2857_s7 = inlined_call_operand.vmem [shape: f32[1,128], index: 7, kind: input, shape index: {}]   ;;  %s2858_s8 = inlined_call_operand.vmem [shape: f32[1,128], index: 8, kind: input, shape index: {}]   ;;  %s2859_s9 = inlined_call_operand.vmem [shape: f32[1,128], index: 9, kind: input, shape index: {}]   ;;  %s2860_s10 = inlined_call_operand.hbm [shape: f32[2,8,8,128], index: 10, kind: output, shape index: {}]  }
   0x1   :  { %2863 = sst [smem:[#allocation19_spill]] %s2851_s1 }
   0x2   :  { %2864 = sst [smem:[#allocation20_spill]] %s2852_s2 }
   0x3   :  { %2865 = sst [smem:[#allocation21_spill]] %s2853_s3 }
   0x4   :  { %15 = vsyncpa [#allocation6], 0 }
   0x5   :  { %17 = vsyncpa [#allocation6 + $0x1], 0 }
   0x6   :  { %18 = vsyncpa [#allocation9], 0 }
   0x7   :  { %19 = vsyncpa [#allocation12], 0 }
   0x8   :  { %20 = vsyncpa [#allocation7], 0 }
   0x9   :  { %22 = vsyncpa [#allocation7 + $0x1], 0  ;;  %s2260_s13 = smov 0   ;;  %s2262_s14 = smov 0  }
   0xa   :  { %s2264_s15 = smov 0   ;;  %s2266_s16 = smov 0  }
   0xb LB: > { %s2281_s17 = sadd.s32 4294967295, %s2195_s16   ;;  %s1854_s18 = sadd.s32 4294967294, %s2195_s16   ;;  %s2195_s16 = sphi %s2266_s16, %s2883_s16   ;;  %s2191_s15 = sphi %s2264_s15, %s2882_s15   ;;  %s2187_s14 = sphi %s2262_s14, %s2881_s14   ;;  %s2183_s13 = sphi %s2260_s13, %s2880_s13  }
   0xc   : > { %p48_p0 = scmp.ne.s32.totalorder %s2187_s14, %s2183_s13  ;;  %p49_p1 = scmp.eq.s32.totalorder %s2281_s17, 0 }
   0xd   : > { %p261_p2 = scmp.eq.s32.totalorder %s2281_s17, 1  ;;  %p267_p3 = scmp.eq.s32.totalorder %s1854_s18, 1 }
   0xe   : > { %p2290_p4 = por %p49_p1, %p48_p0  ;;  %p1855_p5 = scmp.ge.s32.totalorder %s2195_s16, 1 }
   0xf   : > { %p2295_p6 = por %p267_p3, %p48_p0  ;;  %p274_p7 = scmp.lt.s32.totalorder %s2195_s16, 3 }
  0x10   : > { %s2868_s1 = sld [smem:[#allocation19_spill]]  ;;  %s2197_s25 = smov [#allocation8]  }
  0x11   : > { %p2303_p8 = pnand %p1855_p5, %p274_p7  ;;  %s287_s26 = sshll.u32 %s2197_s25, 4  ;;  %s288_s26 = int_to_ptr.vmem [resolvable:$true] %s287_s26 }
  0x12   : > { %s2871_s2 = sld [smem:[#allocation20_spill]]  ;;  %s2861_s11 = smov 128  }
  0x13   : > { %p1928_p9 = pneg %p2303_p8  ;;  %s2862_s12 = smov 8  }
  0x14   : > { %s2200_s18 = smov [#allocation10]   ;;  %s2872_s3 = sld [smem:[#allocation21_spill]] }
  0x15   : > { %p2311_p10 = pnand %p1928_p9, %p49_p1  ;;  %s301_s21 = sshll.u32 %s2200_s18, 4  ;;  %s302_s21 = int_to_ptr.vmem [resolvable:$true] %s301_s21 }
  0x16   : > { %s285_s23 = sshll.u32 %s2868_s1, 4  ;;  %s2333_s29 = sadd.s32 1, %s2195_s16   ;;  %s286_s23 = int_to_ptr.hbm [resolvable:$true] %s285_s23 }
  0x17   : > { %1931 = dma.hbm_to_vmem [thread:$0]  (!%p2311_p10), %s286_s23, 1024, %s288_s26, [#allocation9], %s2861_s11, %s2861_s11, %s2862_s12  }
  0x18   : > { %s299_s30 = sshll.u32 %s2871_s2, 4  ;;  %s2201_s23 = smov [#allocation11]   ;;  %s300_s30 = int_to_ptr.hbm [resolvable:$true] %s299_s30 }
  0x19   : > { %1934 = dma.hbm_to_vmem [thread:$0]  (!%p2311_p10), %s300_s30, 18432, %s302_s21, [#allocation9], %s2861_s11, %s2861_s11, %s2862_s12  }
  0x1a   : > { %s313_s28 = sshll.u32 %s2872_s3, 4  ;;  %s315_s26 = sshll.u32 %s2201_s23, 4  ;;  %s314_s28 = int_to_ptr.hbm [resolvable:$true] %s313_s28  ;;  %s316_s26 = int_to_ptr.vmem [resolvable:$true] %s315_s26 }
  0x1b   : > { %1937 = dma.hbm_to_vmem [thread:$0]  (!%p2311_p10), %s314_s28, 2048, %s316_s26, [#allocation12], %s2861_s11, %s2861_s11, %s2862_s12  }
  0x1c   : > { %s32_s18 = ssub.s32 %s2195_s16, %s2333_s29  ;;  %s35_s22 = sadd.s32 1, %s2191_s15 }
  0x1d   : > { %p33_p12 = scmp.eq.s32.totalorder %s32_s18, 0  ;;  %p42_p13 = scmp.ne.s32.totalorder %s2191_s15, %s2187_s14 }
  0x1e   : > { %p43_p0 = scmp.eq.s32.totalorder %s2195_s16, 0  ;;  %p1949_p5 = scmp.lt.s32.totalorder %s2195_s16, 2 }
  0x1f   : > { %s2347_s25 = scalar_select %p33_p12, %s2191_s15, %s35_s22  }
  0x20   : > { %p2351_p3 = por %p261_p2, %p42_p13  ;;  %s347_s21 = sand.u32 1, %s2191_s15  }
  0x21   : > { %2873 = sst [smem:[#allocation18_spill]] %s2347_s25  ;;  %s1906_s27 = sshll.u32 %s2195_s16, 6 }
  0x22   : > { %p44_p7 = por %p43_p0, %p42_p13  ;;  %s1860_s23 = sshll.u32 %s347_s21, 6 }
  0x23   : > { %s356_s28 = scalar_lea.hbm %s2850_s0, %s1906_s27  ;;  %s351_s18 = scalar_lea.vmem [#allocation5], %s1860_s23 }
  0x24   : > { %s357_s26 = sshll.u32 %s356_s28, 4  ;;  %s359_s11 = sshll.u32 %s351_s18, 4  ;;  %s358_s26 = int_to_ptr.hbm [resolvable:$true] %s357_s26  ;;  %s360_s11 = int_to_ptr.vmem [resolvable:$true] %s359_s11 }
  0x25   : > { %p2361_p9 = pnand %p1949_p5, %p44_p7  ;;  %s348_s12 = scalar_lea.sflag [#allocation6], %s347_s21 }
  0x26   : > { %s2091_s3 = sshra.s32 %s358_s26, 4  ;;  %s2098_s27 = scalar_lea.hbm %s2850_s0, 128  ;;  %s2092_s3 = int_to_ptr.hbm [resolvable:$true] %s2091_s3 }
  0x27   : > { %s2093_s25 = scalar_lea.hbm %s2092_s3, 64  ;;  %p2095_p10 = pneg %p2361_p9 }
  0x28   : > { %p2094_p2 = scmp.ne.s32.totalorder %s2092_s3, %s2093_s25  ;;  %p2099_p0 = scmp.lt.s32.totalorder %s2092_s3, %s2850_s0 }
  0x29   : > { %p2100_p5 = scmp.lt.s32.totalorder %s2098_s27, %s2093_s25 }
  0x2a   : > { %p2096_p12 = pnand %p2095_p10, %p2094_p2 }
  0x2b   : > { %p2101_p7 = por %p2100_p5, %p2099_p0 }
  0x2c   : > { %p2097_p13 = pneg %p2096_p12 }
  0x2e   : > { %p2102_p11 = pnand %p2101_p7, %p2097_p13 }
  0x30   : > { %2105 = shalt.err (!%p2102_p11)
}
  0x31   : > { %s2876_s21 = smov 8   ;;  %s2877_s18 = smov 128  }
  0x32   : > { %1941 = dma.hbm_to_vmem [thread:$0]  (!%p2361_p9), %s358_s26, 1024, %s360_s11, %s348_s12, %s2877_s18, %s2877_s18, %s2876_s21  }
  0x33   : > { %371 = sbr.rel (%p2303_p8) target bundleno = 737 (0x2e1), region = 60  ;;  %s2381_s1 = sand.u32 (!%p2303_p8), 1, %s2187_s14  }
  0x34   : > { %s1864_s3 = sshll.u32 (!%p2303_p8), %s2381_s1, 6  ;;  %s374_s25 = scalar_lea.sflag (!%p2303_p8), [#allocation6], %s2381_s1 }
  0x35   : > { %s2387_s2 = scalar_lea.vmem (!%p2303_p8), [#allocation5], %s1864_s3 }
  0x38   : > { %2166 = dma.done.wait (%p2290_p4), %s374_s25, 1024  }
  0x39   : > { %2168 = vsyncadd (%p2290_p4), %s374_s25, 4294966272 }
  0x3a   : > { %2170 = dma.done.wait (%p49_p1), [#allocation9], 19456  }
  0x3b   : > { %2172 = vsyncadd (%p49_p1), [#allocation9], 4294947840 }
  0x3c   : > { %2174 = dma.done.wait (%p49_p1), [#allocation12], 2048  }
  0x3d   : > { %2176 = vsyncadd (%p49_p1), [#allocation12], 4294965248  ;;  %vm430_vm0 = vcmask 130048   ;;  %v2202_v0 = vmov 0.0   ;;  %v485_v1 = vld [vmem:[#allocation8 + $0x18] sm:$0xff]  ;;  %v475_v2 = vld [vmem:[#allocation8 + $0x8] sm:$0xff] }
  0x3e   : > { %440 = vst.msk [vmem:[#allocation2 + $0x48] sm:$0xff] %vm430_vm0, %v2202_v0  ;;  %v484_v3 = vld [vmem:[#allocation8 + $0x10] sm:$0xff]  ;;  %1908 = vmatpush.msra.mxu2 %v485_v1  ;;  %1910 = vmatpush.msra.mxu3 %v475_v2  ;;  %v474_v4 = vld [vmem:[#allocation8] sm:$0xff]  ;;  %v452_v5 = vld [vmem:[%s2387_s2 + $0x18] sm:$0xff]  ;;  %s1737_s22 = scalar_lea.sflag [#allocation7], %s2381_s1  ;;  %s2141_s21 = scalar_lea.hbm %s2860_s10, 128 }
  0x3f   : > { %431 = vst.msk [vmem:[#allocation2] sm:$0xff] %vm430_vm0, %v2202_v0  ;;  %v625_v6 = vld [vmem:[#allocation8 + $0x28] sm:$0xff]  ;;  %v708_v7 = vld [vmem:[#allocation8 + $0x38] sm:$0xff]  ;;  %524 = vmatpush.msra.mxu0 %v485_v1  ;;  %589 = vmatpush.msra.mxu1 %v475_v2  ;;  %v624_v10 = vld [vmem:[#allocation8 + $0x20] sm:$0xff] }
  0x40   : > { %432 = vst.msk [vmem:[#allocation2 + $0x8] sm:$0xff] %vm430_vm0, %v2202_v0  ;;  %1909 = vmatpush.msra.mxu2 %v484_v3  ;;  %1911 = vmatpush.msra.mxu3 %v474_v4  ;;  %v707_v11 = vld [vmem:[#allocation8 + $0x30] sm:$0xff]  ;;  %v453_v12 = vld [vmem:[%s2387_s2 + $0x20] sm:$0xff]  ;;  %v454_v13 = vld [vmem:[%s2387_s2 + $0x28] sm:$0xff] }
  0x41   : > { %433 = vst.msk [vmem:[#allocation2 + $0x10] sm:$0xff] %vm430_vm0, %v2202_v0  ;;  %525 = vmatpush.msra.mxu0 %v484_v3  ;;  %590 = vmatpush.msra.mxu1 %v474_v4  ;;  %v455_v14 = vld [vmem:[%s2387_s2 + $0x30] sm:$0xff]  ;;  %v449_v15 = vld [vmem:[%s2387_s2] sm:$0xff]  ;;  %v450_v18 = vld [vmem:[%s2387_s2 + $0x8] sm:$0xff] }
  0x42   : > { %434 = vst.msk [vmem:[#allocation2 + $0x18] sm:$0xff] %vm430_vm0, %v2202_v0  ;;  %664 = vmatpush.msrb.mxu2 %v625_v6  ;;  %747 = vmatpush.msrb.mxu3 %v708_v7  ;;  %v451_v21 = vld [vmem:[%s2387_s2 + $0x10] sm:$0xff]  ;;  %v456_v32 = vld [vmem:[%s2387_s2 + $0x38] sm:$0xff]  ;;  %v1107_v41 = vld [vmem:[#allocation10 + $0xe8] sm:$0xff]  ;;  %s2806_s2 = scalar_lea.vmem [#allocation13], %s1864_s3  ;;  %s1907_s3 = sshll.u32 %s2281_s17, 6 }
  0x43   : > { %435 = vst.msk [vmem:[#allocation2 + $0x20] sm:$0xff] %vm430_vm0, %v2202_v0  ;;  %v1109_v35 = vld [vmem:[#allocation10 + $0xf8] sm:$0xff]  ;;  %v1108_v36 = vld [vmem:[#allocation10 + $0xf0] sm:$0xff]  ;;  %v1123_v42 = vld [vmem:[#allocation10 + $0x168] sm:$0xff]  ;;  %s1748_s11 = scalar_lea.hbm %s2860_s10, %s1907_s3  ;;  %s1749_s12 = sshll.u32 %s2806_s2, 4  ;;  %s1750_s12 = int_to_ptr.vmem [resolvable:$true] %s1749_s12 }
  0x44   : > { %436 = vst.msk [vmem:[#allocation2 + $0x28] sm:$0xff] %vm430_vm0, %v2202_v0  ;;  %665 = vmatpush.msrb.mxu2 %v624_v10  ;;  %748 = vmatpush.msrb.mxu3 %v707_v11  ;;  %v1125_v37 = vld [vmem:[#allocation10 + $0x178] sm:$0xff]  ;;  %v1124_v38 = vld [vmem:[#allocation10 + $0x170] sm:$0xff]  ;;  %v1106_v43 = vld [vmem:[#allocation10 + $0xe0] sm:$0xff]  ;;  %s1751_s26 = sshll.u32 %s1748_s11, 4  ;;  %s1752_s26 = int_to_ptr.hbm [resolvable:$true] %s1751_s26 }
  0x45   : > { %437 = vst.msk [vmem:[#allocation2 + $0x30] sm:$0xff] %vm430_vm0, %v2202_v0  ;;  %1263 = vmatpush.msrb.mxu1 %v1109_v35  ;;  %v1093_v39 = vld [vmem:[#allocation10 + $0x78] sm:$0xff]  ;;  %v1092_v40 = vld [vmem:[#allocation10 + $0x70] sm:$0xff]  ;;  %v1122_v45 = vld [vmem:[#allocation10 + $0x160] sm:$0xff]  ;;  %s2135_s27 = sshra.s32 %s1752_s26, 4  ;;  %s2136_s27 = int_to_ptr.hbm [resolvable:$true] %s2135_s27 }
  0x46   : > { %461 = vst.msk [vmem:[#allocation2 + $0x48] sm:$0xff] %vm430_vm0, %v452_v5  ;;  %1222 = vmatpush.msrb.mxu0 %v1093_v39  ;;  %v1105_v44 = vld [vmem:[#allocation10 + $0xd8] sm:$0xff]  ;;  %v1104_v46 = vld [vmem:[#allocation10 + $0xd0] sm:$0xff]  ;;  %v1091_v47 = vld [vmem:[#allocation10 + $0x68] sm:$0xff]  ;;  %s2137_s17 = scalar_lea.hbm %s2136_s27, 64  ;;  %p2142_p11 = scmp.lt.s32.totalorder %s2136_s27, %s2860_s10 }
  0x47   : > { %438 = vst.msk [vmem:[#allocation2 + $0x38] sm:$0xff] %vm430_vm0, %v2202_v0  ;;  %v476_v16 = vld [vmem:[#allocation2 + $0x8] sm:$0xff]  ;;  %1264 = vmatpush.msrb.mxu1 %v1108_v36  ;;  %v1121_v48 = vld [vmem:[#allocation10 + $0x158] sm:$0xff]  ;;  %v1090_v49 = vld [vmem:[#allocation10 + $0x60] sm:$0xff]  ;;  %p2138_p1 = scmp.ne.s32.totalorder %s2136_s27, %s2137_s17  ;;  %p2143_p9 = scmp.lt.s32.totalorder %s2141_s21, %s2137_s17 }
  0x48   : > { %439 = vst.msk [vmem:[#allocation2 + $0x40] sm:$0xff] %vm430_vm0, %v2202_v0  ;;  %v466_v17 = vld [vmem:[#allocation2 + $0x7] sm:$0xff]  ;;  %1869 = vmatmul.msk.f32.vlgmr.msra.gmra.mxu0 %vm430_vm0, %v476_v16  ;;  %v1120_v50 = vld [vmem:[#allocation10 + $0x150] sm:$0xff]  ;;  %v1089_v51 = vld [vmem:[#allocation10 + $0x58] sm:$0xff] }
  0x49   : > { %441 = vst.msk [vmem:[#allocation2 + $0x50] sm:$0xff] %vm430_vm0, %v2202_v0  ;;  %1877 = vmatmul.msk.f32.vlgmr.msra.gmra.mxu1 %vm430_vm0, %v466_v17  ;;  %1223 = vmatpush.msrb.mxu0 %v1092_v40  ;;  %v1119_v52 = vld [vmem:[#allocation10 + $0x148] sm:$0xff]  ;;  %v1141_v53 = vld [vmem:[#allocation10 + $0x1f8] sm:$0xff]  ;;  %v1102_v55 = vld [vmem:[#allocation10 + $0xc0] sm:$0xff]  ;;  %p2139_p4 = pnand %p2138_p1, %p2351_p3  ;;  %p2144_p2 = por %p2143_p9, %p2142_p11 }
  0x4a   : > { %442 = vst.msk [vmem:[#allocation2 + $0x58] sm:$0xff] %vm430_vm0, %v2202_v0  ;;  %1265 = vmatpush.msrb.mxu1 %v1107_v41  ;;  %v1103_v54 = vld [vmem:[#allocation10 + $0xc8] sm:$0xff]  ;;  %v1088_v56 = vld [vmem:[#allocation10 + $0x50] sm:$0xff]  ;;  %v1101_v57 = vld [vmem:[#allocation10 + $0xb8] sm:$0xff] }
  0x4b   : > { %443 = vst.msk [vmem:[#allocation2 + $0x60] sm:$0xff] %vm430_vm0, %v2202_v0  ;;  %1224 = vmatpush.msrb.mxu0 %v1091_v47  ;;  %v1118_v58 = vld [vmem:[#allocation10 + $0x140] sm:$0xff]  ;;  %v1140_v59 = vld [vmem:[#allocation10 + $0x1f0] sm:$0xff]  ;;  %v1087_v61 = vld [vmem:[#allocation10 + $0x48] sm:$0xff]  ;;  %p2140_p8 = pneg %p2139_p4 }
  0x4c   : > { %444 = vst.msk [vmem:[#allocation2 + $0x68] sm:$0xff] %vm430_vm0, %v2202_v0  ;;  %1266 = vmatpush.msrb.mxu1 %v1106_v43  ;;  %v1100_v60 = vld [vmem:[#allocation10 + $0xb0] sm:$0xff]  ;;  %v1117_v62 = vld [vmem:[#allocation10 + $0x138] sm:$0xff]  ;;  %v1139_v63 = vld [vmem:[#allocation10 + $0x1e8] sm:$0xff] }
  0x4d   : > { %v2431_v8 = vld [vmem:[#allocation2 + $0x48] sm:$0xff]  ;;  %445 = vst.msk [vmem:[#allocation2 + $0x70] sm:$0xff] %vm430_vm0, %v2202_v0  ;;  %1225 = vmatpush.msrb.mxu0 %v1090_v49  ;;  %v1086_v1 = vld [vmem:[#allocation10 + $0x40] sm:$0xff]  ;;  %v1116_v2 = vld [vmem:[#allocation10 + $0x130] sm:$0xff]  ;;  %p2145_p10 = pnand %p2144_p2, %p2140_p8 }
  0x4e   : > { %1873 = vmatmul.msk.f32.vlgmr.msra.gmra.mxu2 %vm430_vm0, %v2431_v8  ;;  %446 = vst.msk [vmem:[#allocation2 + $0x78] sm:$0xff] %vm430_vm0, %v2202_v0  ;;  %1267 = vmatpush.msrb.mxu1 %v1105_v44  ;;  %v1138_v3 = vld [vmem:[#allocation10 + $0x1e0] sm:$0xff]  ;;  %v1085_v4 = vld [vmem:[#allocation10 + $0x38] sm:$0xff]  ;;  %v1115_v5 = vld [vmem:[#allocation10 + $0x128] sm:$0xff] }
  0x4f   : > { %447 = vst.msk [vmem:[#allocation2 + $0x80] sm:$0xff] %vm430_vm0, %v2202_v0  ;;  %v2441_v9 = vld [vmem:[#allocation2 + $0x47] sm:$0xff]  ;;  %1304 = vmatpush.msra.mxu2 %v1125_v37  ;;  %1226 = vmatpush.msrb.mxu0 %v1089_v51  ;;  %v1137_v6 = vld [vmem:[#allocation10 + $0x1d8] sm:$0xff]  ;;  %v1128_v39 = vld [vmem:[#allocation10 + $0x190] sm:$0xff] }
  0x50   : > { %448 = vst.msk [vmem:[#allocation2 + $0x88] sm:$0xff] %vm430_vm0, %v2202_v0  ;;  %1881 = vmatmul.msk.f32.vlgmr.msra.gmra.mxu3 %vm430_vm0, %v2441_v9  ;;  %1268 = vmatpush.msrb.mxu1 %v1104_v46  ;;  %v1099_v7 = vld [vmem:[#allocation10 + $0xa8] sm:$0xff]  ;;  %v1113_v17 = vld [vmem:[#allocation10 + $0x118] sm:$0xff]  ;;  %v1078_v35 = vld [vmem:[#allocation10] sm:$0xff] }
  0x51   : > { %822 = vst [vmem:[#allocation3] sm:$0xff] %v2202_v0  ;;  %1305 = vmatpush.msra.mxu2 %v1124_v38  ;;  %1345 = vmatpush.msra.mxu3 %v1141_v53  ;;  %v1083_v16 = vld [vmem:[#allocation10 + $0x28] sm:$0xff]  ;;  %v1130_v36 = vld [vmem:[#allocation10 + $0x1a0] sm:$0xff]  ;;  %v1129_v38 = vld [vmem:[#allocation10 + $0x198] sm:$0xff] }
  0x52   : > { %823 = vst [vmem:[#allocation3 + $0x8] sm:$0xff] %v2202_v0  ;;  %1269 = vmatpush.msrb.mxu1 %v1103_v54  ;;  %1227 = vmatpush.msrb.mxu0 %v1088_v56  ;;  %v1156_v46 = vld [vmem:[#allocation10 + $0x270] sm:$0xff]  ;;  %v1154_v53 = vld [vmem:[#allocation10 + $0x260] sm:$0xff] }
  0x53   : > { %824 = vst [vmem:[#allocation3 + $0x10] sm:$0xff] %v2202_v0  ;;  %1306 = vmatpush.msra.mxu2 %v1123_v42  ;;  %1346 = vmatpush.msra.mxu3 %v1140_v59  ;;  %v1127_v42 = vld [vmem:[#allocation10 + $0x188] sm:$0xff]  ;;  %v2540_v59 = vld [vmem:[%s2855_s5] ss:$0 sm:$0xff] }
  0x54   : > { %825 = vst [vmem:[#allocation3 + $0x18] sm:$0xff] %v2202_v0  ;;  %1270 = vmatpush.msrb.mxu1 %v1102_v55  ;;  %1228 = vmatpush.msrb.mxu0 %v1087_v61 }
  0x55   : > { %827 = vst [vmem:[#allocation3 + $0x28] sm:$0xff] %v2202_v0  ;;  %1307 = vmatpush.msra.mxu2 %v1122_v45  ;;  %1347 = vmatpush.msra.mxu3 %v1139_v63  ;;  %v1157_v45 = vld [vmem:[#allocation10 + $0x278] sm:$0xff]  ;;  %v1152_v63 = vld [vmem:[#allocation10 + $0x250] sm:$0xff] }
  0x56   : > { %828 = vst [vmem:[#allocation3 + $0x30] sm:$0xff] %v2202_v0  ;;  %1271 = vmatpush.msrb.mxu1 %v1101_v57  ;;  %1229 = vmatpush.msrb.mxu0 %v1086_v1  ;;  %v2535_v57 = vld [vmem:[%s2854_s4] ss:$0 sm:$0xff]  ;;  %v1173_v1 = vld [vmem:[#allocation10 + $0x2f8] sm:$0xff] }
  0x57   : > { %830 = vst [vmem:[#allocation3 + $0x40] sm:$0xff] %v2202_v0  ;;  %1308 = vmatpush.msra.mxu2 %v1121_v48  ;;  %1348 = vmatpush.msra.mxu3 %v1138_v3 }
  0x58   : > { %831 = vst [vmem:[#allocation3 + $0x48] sm:$0xff] %v2202_v0  ;;  %1272 = vmatpush.msrb.mxu1 %v1100_v60  ;;  %1230 = vmatpush.msrb.mxu0 %v1085_v4 }
  0x59   : > { %833 = vst [vmem:[#allocation3 + $0x58] sm:$0xff] %v2202_v0  ;;  %1309 = vmatpush.msra.mxu2 %v1120_v50  ;;  %1349 = vmatpush.msra.mxu3 %v1137_v6  ;;  %v861_v37 = vld [vmem:[#allocation3 + $0x7] sm:$0xff] }
  0x5a   : > { %834 = vst [vmem:[#allocation3 + $0x60] sm:$0xff] %v2202_v0  ;;  %1273 = vmatpush.msrb.mxu1 %v1099_v7  ;;  %v1172_v7 = vld [vmem:[#allocation10 + $0x2f0] sm:$0xff] }
  0x5b   : > { %836 = vst [vmem:[#allocation3 + $0x70] sm:$0xff] %v2202_v0  ;;  %1310 = vmatpush.msra.mxu2 %v1119_v52  ;;  %v1155_v52 = vld [vmem:[#allocation10 + $0x268] sm:$0xff] }
  0x5c   : > { %837 = vst [vmem:[#allocation3 + $0x78] sm:$0xff] %v2202_v0 }
  0x5d   : > { %839 = vst [vmem:[#allocation3 + $0x88] sm:$0xff] %v2202_v0  ;;  %1311 = vmatpush.msra.mxu2 %v1118_v58 }
  0x5e   : > { %840 = vst [vmem:[#allocation3 + $0x90] sm:$0xff] %v2202_v0 }
  0x5f   : > { %842 = vst [vmem:[#allocation3 + $0xa0] sm:$0xff] %v2202_v0  ;;  %1312 = vmatpush.msra.mxu2 %v1117_v62  ;;  %v1153_v62 = vld [vmem:[#allocation10 + $0x258] sm:$0xff] }
  0x60   : > { %843 = vst [vmem:[#allocation3 + $0xa8] sm:$0xff] %v2202_v0 }
  0x61   : > { %845 = vst [vmem:[#allocation3 + $0xb8] sm:$0xff] %v2202_v0  ;;  %1313 = vmatpush.msra.mxu2 %v1116_v2 }
  0x62   : > { %846 = vst [vmem:[#allocation3 + $0xc0] sm:$0xff] %v2202_v0 }
  0x63   : > { %848 = vst [vmem:[#allocation3 + $0xd0] sm:$0xff] %v2202_v0  ;;  %1314 = vmatpush.msra.mxu2 %v1115_v5 }
  0x64   : > { %849 = vst [vmem:[#allocation3 + $0xd8] sm:$0xff] %v2202_v0 }
  0x65   : > { %850 = vst [vmem:[#allocation3 + $0xe0] sm:$0xff] %v2202_v0 }
  0x66   : > { %851 = vst [vmem:[#allocation3 + $0xe8] sm:$0xff] %v2202_v0 }
  0x67   : > { %462 = vst.msk [vmem:[#allocation2 + $0x58] sm:$0xff] %vm430_vm0, %v453_v12  ;;  %v1097_v12 = vld [vmem:[#allocation10 + $0x98] sm:$0xff] }
  0x68   : > { %463 = vst.msk [vmem:[#allocation2 + $0x68] sm:$0xff] %vm430_vm0, %v454_v13  ;;  %v1114_v13 = vld [vmem:[#allocation10 + $0x120] sm:$0xff] }
  0x69   : > { %464 = vst.msk [vmem:[#allocation2 + $0x78] sm:$0xff] %vm430_vm0, %v455_v14  ;;  %v1136_v14 = vld [vmem:[#allocation10 + $0x1d0] sm:$0xff]  ;;  %1315 = vmatpush.msra.mxu2 %v1114_v13 }
  0x6a   : > { %458 = vst.msk [vmem:[#allocation2 + $0x18] sm:$0xff] %vm430_vm0, %v449_v15  ;;  %v1096_v15 = vld [vmem:[#allocation10 + $0x90] sm:$0xff]  ;;  %1350 = vmatpush.msra.mxu3 %v1136_v14 }
  0x6b   : > { %459 = vst.msk [vmem:[#allocation2 + $0x28] sm:$0xff] %vm430_vm0, %v450_v18  ;;  %v1135_v18 = vld [vmem:[#allocation10 + $0x1c8] sm:$0xff]  ;;  %1316 = vmatpush.msra.mxu2 %v1113_v17 }
  0x6c   : > { %460 = vst.msk [vmem:[#allocation2 + $0x38] sm:$0xff] %vm430_vm0, %v451_v21  ;;  %1351 = vmatpush.msra.mxu3 %v1135_v18  ;;  %v1112_v21 = vld [vmem:[#allocation10 + $0x110] sm:$0xff]  ;;  %v1151_v18 = vld [vmem:[#allocation10 + $0x248] sm:$0xff] }
  0x6d   : > { %465 = vst.msk [vmem:[#allocation2 + $0x88] sm:$0xff] %vm430_vm0, %v456_v32  ;;  %1317 = vmatpush.msra.mxu2 %v1112_v21  ;;  %v893_v32 = vld [vmem:[#allocation3 + $0x9] sm:$0xff] }
  0x6e   : > { %v481_v19 = vld [vmem:[#allocation2 + $0x58] sm:$0xff] }
  0x6f   : > { %v471_v20 = vld [vmem:[#allocation2 + $0x57] sm:$0xff]  ;;  %1874 = vmatmul.msk.f32.gmra.mxu2 %vm430_vm0, %v481_v19  ;;  %v482_v24 = vld [vmem:[#allocation2 + $0x68] sm:$0xff] }
  0x70   : > { %1882 = vmatmul.msk.f32.gmra.mxu3 %vm430_vm0, %v471_v20  ;;  %v472_v25 = vld [vmem:[#allocation2 + $0x67] sm:$0xff]  ;;  %v483_v28 = vld [vmem:[#allocation2 + $0x78] sm:$0xff] }
  0x71   : > { %v616_v22 = vld [vmem:[#allocation2 + $0x17] sm:$0xff] }
  0x72   : > { %v699_v23 = vld [vmem:[#allocation2 + $0x18] sm:$0xff]  ;;  %1878 = vmatmul.msk.f32.gmra.mxu1 %vm430_vm0, %v616_v22  ;;  %v617_v26 = vld [vmem:[#allocation2 + $0x27] sm:$0xff] }
  0x73   : > { %1870 = vmatmul.msk.f32.gmra.mxu0 %vm430_vm0, %v699_v23  ;;  %v700_v27 = vld [vmem:[#allocation2 + $0x28] sm:$0xff]  ;;  %v473_v29 = vld [vmem:[#allocation2 + $0x77] sm:$0xff] }
  0x74   : > { %v618_v30 = vld [vmem:[#allocation2 + $0x37] sm:$0xff]  ;;  %v623_v33 = vld [vmem:[#allocation2 + $0x87] sm:$0xff] }
  0x75   : > { %v701_v31 = vld [vmem:[#allocation2 + $0x38] sm:$0xff]  ;;  %v706_v34 = vld [vmem:[#allocation2 + $0x88] sm:$0xff] }
  0x76   : > { %v1169_v21 = vld [vmem:[#allocation10 + $0x2d8] sm:$0xff] }
  0x77   : > { %1875 = vmatmul.msk.f32.gmra.mxu2 %vm430_vm0, %v482_v24 }
  0x78   : > { %1883 = vmatmul.msk.f32.gmra.mxu3 %vm430_vm0, %v472_v25 }
  0x7a   : > { %1879 = vmatmul.msk.f32.gmra.mxu1 %vm430_vm0, %v617_v26 }
  0x7b   : > { %1871 = vmatmul.msk.f32.gmra.mxu0 %vm430_vm0, %v700_v27 }
  0x7f   : > { %1876 = vmatmul.msk.f32.gmra.mxu2 %vm430_vm0, %v483_v28 }
  0x80   : > { %1884 = vmatmul.msk.f32.gmra.mxu3 %vm430_vm0, %v473_v29 }
  0x82   : > { %1880 = vmatmul.msk.f32.gmra.mxu1 %vm430_vm0, %v618_v30 }
  0x83   : > { %1872 = vmatmul.msk.f32.gmra.mxu0 %vm430_vm0, %v701_v31 }
  0x87   : > { %1885 = vmatmul.msk.f32.vlgmr.msrb.gmra.mxu2 %vm430_vm0, %v616_v22  ;;  %v1134_v22 = vld [vmem:[#allocation10 + $0x1c0] sm:$0xff] }
  0x88   : > { %1893 = vmatmul.msk.f32.vlgmr.msrb.gmra.mxu3 %vm430_vm0, %v699_v23  ;;  %v1094_v23 = vld [vmem:[#allocation10 + $0x80] sm:$0xff] }
  0x89   : > { %1352 = vmatpush.msra.mxu3 %v1134_v22 }
  0x8f   : > { %1886 = vmatmul.msk.f32.gmra.mxu2 %vm430_vm0, %v617_v26  ;;  %v1133_v26 = vld [vmem:[#allocation10 + $0x1b8] sm:$0xff] }
  0x90   : > { %1894 = vmatmul.msk.f32.gmra.mxu3 %vm430_vm0, %v700_v27  ;;  %v1080_v27 = vld [vmem:[#allocation10 + $0x10] sm:$0xff] }
  0x91   : > { %1353 = vmatpush.msra.mxu3 %v1133_v26  ;;  %v1168_v26 = vld [vmem:[#allocation10 + $0x2d0] sm:$0xff] }
  0x97   : > { %1887 = vmatmul.msk.f32.gmra.mxu2 %vm430_vm0, %v618_v30 }
  0x98   : > { %1895 = vmatmul.msk.f32.gmra.mxu3 %vm430_vm0, %v701_v31 }
  0x9f   : > { %1888 = vmatmul.msk.f32.gmra.mxu2 %vm430_vm0, %v2441_v9  ;;  %v1084_v9 = vld [vmem:[#allocation10 + $0x30] sm:$0xff] }
  0xa0   : > { %1896 = vmatmul.msk.f32.gmra.mxu3 %vm430_vm0, %v2431_v8  ;;  %v1098_v8 = vld [vmem:[#allocation10 + $0xa0] sm:$0xff]  ;;  %1231 = vmatpush.msrb.mxu0 %v1084_v9 }
  0xa1   : > { %1274 = vmatpush.msrb.mxu1 %v1098_v8 }
  0xa2   : > { %1232 = vmatpush.msrb.mxu0 %v1083_v16 }
  0xa3   : > { %1275 = vmatpush.msrb.mxu1 %v1097_v12  ;;  %v1171_v12 = vld [vmem:[#allocation10 + $0x2e8] sm:$0xff] }
  0xa5   : > { %1276 = vmatpush.msrb.mxu1 %v1096_v15  ;;  %v1170_v15 = vld [vmem:[#allocation10 + $0x2e0] sm:$0xff] }
  0xa7   : > { %1889 = vmatmul.msk.f32.gmra.mxu2 %vm430_vm0, %v471_v20  ;;  %v1082_v20 = vld [vmem:[#allocation10 + $0x20] sm:$0xff] }
  0xa8   : > { %1897 = vmatmul.msk.f32.gmra.mxu3 %vm430_vm0, %v481_v19  ;;  %v1095_v19 = vld [vmem:[#allocation10 + $0x88] sm:$0xff]  ;;  %1233 = vmatpush.msrb.mxu0 %v1082_v20  ;;  %v1189_v20 = vld [vmem:[#allocation10 + $0x378] sm:$0xff] }
  0xa9   : > { %1277 = vmatpush.msrb.mxu1 %v1095_v19  ;;  %v1150_v19 = vld [vmem:[#allocation10 + $0x240] sm:$0xff] }
  0xab   : > { %1278 = vmatpush.msrb.mxu1 %v1094_v23 }
  0xac   : > { %1279 = vmatmul.f32.vlgmr.msrb.gmra.mxu1 %v2202_v0  ;;  %v1126_v0 = vld [vmem:[#allocation10 + $0x180] sm:$0xff] }
  0xad   : > { %1427 = vmatpush.msra.mxu1 %v1173_v1 }
  0xaf   : > { %1890 = vmatmul.msk.f32.gmra.mxu2 %vm430_vm0, %v472_v25  ;;  %v1111_v25 = vld [vmem:[#allocation10 + $0x108] sm:$0xff]  ;;  %1428 = vmatpush.msra.mxu1 %v1172_v7 }
  0xb0   : > { %1898 = vmatmul.msk.f32.gmra.mxu3 %vm430_vm0, %v482_v24  ;;  %v1081_v24 = vld [vmem:[#allocation10 + $0x18] sm:$0xff]  ;;  %1318 = vmatpush.msra.mxu2 %v1111_v25  ;;  %v1188_v25 = vld [vmem:[#allocation10 + $0x370] sm:$0xff]  ;;  %v1163_v7 = vld [vmem:[#allocation10 + $0x2a8] sm:$0xff] }
  0xb1   : > { %1234 = vmatpush.msrb.mxu0 %v1081_v24  ;;  %1429 = vmatpush.msra.mxu1 %v1171_v12 }
  0xb3   : > { %1235 = vmatpush.msrb.mxu0 %v1080_v27  ;;  %1430 = vmatpush.msra.mxu1 %v1170_v15  ;;  %v1201_v15 = vld [vmem:[#allocation10 + $0x3d8] sm:$0xff] }
  0xb5   : > { %1431 = vmatpush.msra.mxu1 %v1169_v21 }
  0xb7   : > { %1891 = vmatmul.msk.f32.gmra.mxu2 %vm430_vm0, %v473_v29  ;;  %v1132_v29 = vld [vmem:[#allocation10 + $0x1b0] sm:$0xff]  ;;  %1432 = vmatpush.msra.mxu1 %v1168_v26 }
  0xb8   : > { %1899 = vmatmul.msk.f32.gmra.mxu3 %vm430_vm0, %v483_v28  ;;  %v1110_v28 = vld [vmem:[#allocation10 + $0x100] sm:$0xff]  ;;  %v1180_v26 = vld [vmem:[#allocation10 + $0x330] sm:$0xff] }
  0xb9   : > { %1319 = vmatpush.msra.mxu2 %v1110_v28  ;;  %1354 = vmatpush.msra.mxu3 %v1132_v29 }
  0xbb   : > { %1468 = vmatpush.msrb.mxu2 %v1189_v20 }
  0xbd   : > { %1469 = vmatpush.msrb.mxu2 %v1188_v25 }
  0xbf   : > { %1892 = vmatmul.msk.f32.gmra.mxu2 %vm430_vm0, %v623_v33  ;;  %v1079_v33 = vld [vmem:[#allocation10 + $0x8] sm:$0xff] }
  0xc0   : > { %1900 = vmatmul.msk.f32.gmra.mxu3 %vm430_vm0, %v706_v34  ;;  %v1131_v34 = vld [vmem:[#allocation10 + $0x1a8] sm:$0xff]  ;;  %1236 = vmatpush.msrb.mxu0 %v1079_v33 }
  0xc1   : > { %1355 = vmatpush.msra.mxu3 %v1131_v34  ;;  %v1187_v33 = vld [vmem:[#allocation10 + $0x368] sm:$0xff] }
  0xc2   : > { %1237 = vmatpush.msrb.mxu0 %v1078_v35  ;;  %v1167_v34 = vld [vmem:[#allocation10 + $0x2c8] sm:$0xff]  ;;  %1470 = vmatpush.msrb.mxu2 %v1187_v33  ;;  %v1144_v33 = vld [vmem:[#allocation10 + $0x210] sm:$0xff] }
  0xc3   : > { %1356 = vmatpush.msra.mxu3 %v1130_v36  ;;  %1238 = vmatmul.f32.vlgmr.msrb.gmra.mxu0 %v861_v37 }
  0xc4   : > { %1386 = vmatpush.msra.mxu0 %v1157_v45  ;;  %1433 = vmatpush.msra.mxu1 %v1167_v34  ;;  %v1148_v45 = vld [vmem:[#allocation10 + $0x230] sm:$0xff]  ;;  %v1179_v34 = vld [vmem:[#allocation10 + $0x328] sm:$0xff] }
  0xc5   : > { %1357 = vmatpush.msra.mxu3 %v1129_v38  ;;  %v527_v43 = vpop.f32.mrf.mxu0 }
  0xc6   : > { %v592_v44 = vpop.f32.mrf.mxu1  ;;  %1387 = vmatpush.msra.mxu0 %v1156_v46  ;;  %v1185_v46 = vld [vmem:[#allocation10 + $0x358] sm:$0xff] }
  0xc7   : > { %1320 = vmatmul.f32.vlgmr.msra.gmra.mxu2 %v893_v32  ;;  %1358 = vmatpush.msra.mxu3 %v1128_v39  ;;  %v593_v49 = vadd.f32 %v592_v44, %v527_v43  ;;  %v1186_v39 = vld [vmem:[#allocation10 + $0x360] sm:$0xff]  ;;  %v1149_v44 = vld [vmem:[#allocation10 + $0x238] sm:$0xff] }
  0xc8   : > { %1388 = vmatpush.msra.mxu0 %v1155_v52  ;;  %1471 = vmatpush.msrb.mxu2 %v1186_v39  ;;  %v1198_v39 = vld [vmem:[#allocation10 + $0x3c0] sm:$0xff] }
  0xc9   : > { %1359 = vmatpush.msra.mxu3 %v1127_v42 }
  0xca   : > { %1389 = vmatpush.msra.mxu0 %v1154_v53  ;;  %1472 = vmatpush.msrb.mxu2 %v1185_v46 }
  0xcb   : > { %1360 = vmatpush.msra.mxu3 %v1126_v0  ;;  %v1166_v0 = vld [vmem:[#allocation10 + $0x2c0] sm:$0xff] }
  0xcc   : > { %1390 = vmatpush.msra.mxu0 %v1153_v62  ;;  %1434 = vmatpush.msra.mxu1 %v1166_v0  ;;  %v1178_v0 = vld [vmem:[#allocation10 + $0x320] sm:$0xff] }
  0xce   : > { %1391 = vmatpush.msra.mxu0 %v1152_v63 }
  0xd0   : > { %1392 = vmatpush.msra.mxu0 %v1151_v18 }
  0xd1   : > { %v2515_v10 = vpop.f32.mrf.mxu2 }
  0xd2   : > { %1393 = vmatpush.msra.mxu0 %v1150_v19  ;;  %v1181_v19 = vld [vmem:[#allocation10 + $0x338] sm:$0xff] }
  0xd3   : > { %v2517_v11 = vpop.f32.mrf.mxu3 }
  0xd4   : > { %1394 = vmatpush.msra.mxu0 %v1149_v44  ;;  %v605_v12 = vadd.f32 %v2517_v11, %v2515_v10 }
  0xd6   : > { %1395 = vmatpush.msra.mxu0 %v1148_v45  ;;  %v1143_v45 = vld [vmem:[#allocation10 + $0x208] sm:$0xff] }
  0xef   : > { %v595_v51 = vpop.f32.mrf.mxu1 }
  0xf0   : > { %v530_v50 = vpop.f32.mrf.mxu0 }
  0xf1   : > { %v596_v61 = vadd.f32 %v595_v51, %v530_v50  ;;  %v1165_v51 = vld [vmem:[#allocation10 + $0x2b8] sm:$0xff] }
  0xf2   : > { %v2519_v30 = vpop.f32.mrf.mxu2  ;;  %1435 = vmatpush.msra.mxu1 %v1165_v51  ;;  %v1158_v51 = vld [vmem:[#allocation10 + $0x280] sm:$0xff] }
  0xf3   : > { %v2521_v31 = vpop.f32.mrf.mxu3 }
  0xf7   : > { %v598_v4 = vpop.f32.mrf.mxu1 }
  0xf8   : > { %v533_v3 = vpop.f32.mrf.mxu0 }
  0xf9   : > { %v599_v17 = vadd.f32 %v598_v4, %v533_v3  ;;  %v1183_v3 = vld [vmem:[#allocation10 + $0x348] sm:$0xff] }
  0xfa   : > { %v2524_v40 = vpop.f32.mrf.mxu2 }
  0xfb   : > { %v2526_v41 = vpop.f32.mrf.mxu3 }
  0xff   : > { %v601_v32 = vpop.f32.mrf.mxu1 }
 0x100   : > { %v536_v29 = vpop.f32.mrf.mxu0 }
 0x101   : > { %v602_v43 = vadd.f32 %v601_v32, %v536_v29  ;;  %v1199_v29 = vld [vmem:[#allocation10 + $0x3c8] sm:$0xff]  ;;  %v1160_v32 = vld [vmem:[#allocation10 + $0x290] sm:$0xff] }
 0x102   : > { %v2528_v47 = vpop.f32.mrf.mxu2 }
 0x103   : > { %v2530_v48 = vpop.f32.mrf.mxu3 }
 0x10a   : > { %v667_v54 = vpop.f32.mrf.mxu2 }
 0x10b   : > { %v750_v55 = vpop.f32.mrf.mxu3  ;;  %v691_v56 = vadd.f32 %v667_v54, %v593_v49  ;;  %v1205_v49 = vld [vmem:[#allocation10 + $0x3f8] sm:$0xff]  ;;  %v1184_v54 = vld [vmem:[#allocation10 + $0x350] sm:$0xff] }
 0x10c   : > { %1509 = vmatpush.msrb.mxu3 %v1205_v49  ;;  %1473 = vmatpush.msrb.mxu2 %v1184_v54 }
 0x10d   : > { %v774_v58 = vadd.f32 %v750_v55, %v691_v56  ;;  %v1204_v55 = vld [vmem:[#allocation10 + $0x3f0] sm:$0xff] }
 0x10e   : > { %1510 = vmatpush.msrb.mxu3 %v1204_v55  ;;  %1474 = vmatpush.msrb.mxu2 %v1183_v3  ;;  %v1196_v55 = vld [vmem:[#allocation10 + $0x3b0] sm:$0xff] }
 0x10f   : > { %v786_v60 = vmul.f32 %v2535_v57, %v774_v58 }
 0x111   : > { %v798_v2 = vadd.f32 %v2540_v59, %v786_v60  ;;  %v1164_v60 = vld [vmem:[#allocation10 + $0x2b0] sm:$0xff] }
 0x112   : > { %v670_v5 = vpop.f32.mrf.mxu2  ;;  %1436 = vmatpush.msra.mxu1 %v1164_v60  ;;  %v1176_v60 = vld [vmem:[#allocation10 + $0x310] sm:$0xff] }
 0x113   : > { %v753_v6 = vpop.f32.mrf.mxu3  ;;  %v806_v8 = vmax.f32 %v798_v2, 0.0  ;;  %v692_v9 = vadd.f32 %v670_v5, %v596_v61  ;;  %v1203_v61 = vld [vmem:[#allocation10 + $0x3e8] sm:$0xff] }
 0x114   : > { %1511 = vmatpush.msrb.mxu3 %v1203_v61  ;;  %v1147_v5 = vld [vmem:[#allocation10 + $0x228] sm:$0xff]  ;;  %1437 = vmatpush.msra.mxu1 %v1163_v7 }
 0x115   : > { %v2544_v13 = vmin.f32 %v806_v8, 6.0  ;;  %v775_v14 = vadd.f32 %v753_v6, %v692_v9  ;;  %v1202_v6 = vld [vmem:[#allocation10 + $0x3e0] sm:$0xff]  ;;  %1396 = vmatpush.msra.mxu0 %v1147_v5  ;;  %v1195_v61 = vld [vmem:[#allocation10 + $0x3a8] sm:$0xff] }
 0x116   : > { %v1146_v8 = vld [vmem:[#allocation10 + $0x220] sm:$0xff]  ;;  %1512 = vmatpush.msrb.mxu3 %v1202_v6  ;;  %v1175_v7 = vld [vmem:[#allocation10 + $0x308] sm:$0xff] }
 0x117   : > { %853 = vst [vmem:[#allocation3 + $0x20] sm:$0xff] %v2544_v13  ;;  %v787_v16 = vmul.f32 %v2535_v57, %v775_v14  ;;  %1282 = vmatmul.f32.gmra.mxu1 %v2544_v13  ;;  %v1182_v9 = vld [vmem:[#allocation10 + $0x340] sm:$0xff]  ;;  %1397 = vmatpush.msra.mxu0 %v1146_v8 }
 0x118   : > { %1475 = vmatpush.msrb.mxu2 %v1182_v9  ;;  %1513 = vmatpush.msrb.mxu3 %v1201_v15  ;;  %v1194_v8 = vld [vmem:[#allocation10 + $0x3a0] sm:$0xff] }
 0x119   : > { %v799_v22 = vadd.f32 %v2540_v59, %v787_v16  ;;  %v1162_v16 = vld [vmem:[#allocation10 + $0x2a0] sm:$0xff] }
 0x11a   : > { %v673_v23 = vpop.f32.mrf.mxu2  ;;  %1438 = vmatpush.msra.mxu1 %v1162_v16  ;;  %1476 = vmatpush.msrb.mxu2 %v1181_v19 }
 0x11b   : > { %v756_v24 = vpop.f32.mrf.mxu3  ;;  %v807_v27 = vmax.f32 %v799_v22, 0.0  ;;  %v693_v28 = vadd.f32 %v673_v23, %v599_v17  ;;  %v1200_v22 = vld [vmem:[#allocation10 + $0x3d0] sm:$0xff]  ;;  %v1161_v23 = vld [vmem:[#allocation10 + $0x298] sm:$0xff] }
 0x11c   : > { %1514 = vmatpush.msrb.mxu3 %v1200_v22  ;;  %1439 = vmatpush.msra.mxu1 %v1161_v23  ;;  %v614_v22 = vadd.f32 %v2530_v48, %v2528_v47  ;;  %v1190_v47 = vld [vmem:[#allocation10 + $0x380] sm:$0xff] }
 0x11d   : > { %v2550_v35 = vmin.f32 %v807_v27, 6.0  ;;  %v776_v36 = vadd.f32 %v756_v24, %v693_v28  ;;  %v1145_v28 = vld [vmem:[#allocation10 + $0x218] sm:$0xff]  ;;  %1477 = vmatpush.msrb.mxu2 %v1180_v26 }
 0x11e   : > { %v862_v37 = vld [vmem:[#allocation3 + $0x1f] sm:$0xff]  ;;  %1398 = vmatpush.msra.mxu0 %v1145_v28  ;;  %1515 = vmatpush.msrb.mxu3 %v1199_v29 }
 0x11f   : > { %v2552_v38 = vld [vmem:[#allocation3 + $0x21] sm:$0xff]  ;;  %854 = vst [vmem:[#allocation3 + $0x38] sm:$0xff] %v2550_v35  ;;  %v788_v42 = vmul.f32 %v2535_v57, %v776_v36  ;;  %1241 = vmatmul.f32.gmra.mxu0 %v862_v37  ;;  %1361 = vmatmul.f32.vlgmr.msra.gmra.mxu3 %v862_v37  ;;  %v608_v36 = vadd.f32 %v2521_v31, %v2519_v30  ;;  %v1191_v28 = vld [vmem:[#allocation10 + $0x388] sm:$0xff] }
 0x120   : > { %1323 = vmatmul.f32.gmra.mxu2 %v2552_v38  ;;  %1285 = vmatmul.f32.gmra.mxu1 %v2550_v35 }
 0x121   : > { %v800_v50 = vadd.f32 %v2540_v59, %v788_v42  ;;  %v1159_v42 = vld [vmem:[#allocation10 + $0x288] sm:$0xff]  ;;  %1440 = vmatpush.msra.mxu1 %v1160_v32  ;;  %1399 = vmatpush.msra.mxu0 %v1144_v33 }
 0x122   : > { %v676_v52 = vpop.f32.mrf.mxu2  ;;  %1478 = vmatpush.msrb.mxu2 %v1179_v34  ;;  %1516 = vmatpush.msrb.mxu3 %v1198_v39  ;;  %v1217_v39 = vld [vmem:[#allocation10 + $0x458] sm:$0xff] }
 0x123   : > { %v759_v53 = vpop.f32.mrf.mxu3  ;;  %v808_v56 = vmax.f32 %v800_v50, 0.0  ;;  %v694_v58 = vadd.f32 %v676_v52, %v602_v43  ;;  %v1197_v50 = vld [vmem:[#allocation10 + $0x3b8] sm:$0xff]  ;;  %1441 = vmatpush.msra.mxu1 %v1159_v42  ;;  %1400 = vmatpush.msra.mxu0 %v1143_v45  ;;  %v1216_v42 = vld [vmem:[#allocation10 + $0x450] sm:$0xff] }
 0x124   : > { %1479 = vmatpush.msrb.mxu2 %v1178_v0  ;;  %v1177_v52 = vld [vmem:[#allocation10 + $0x318] sm:$0xff]  ;;  %1517 = vmatpush.msrb.mxu3 %v1197_v50 }
 0x125   : > { %v2559_v62 = vmin.f32 %v808_v56, 6.0  ;;  %v777_v63 = vadd.f32 %v759_v53, %v694_v58  ;;  %1442 = vmatpush.msra.mxu1 %v1158_v51  ;;  %v1142_v58 = vld [vmem:[#allocation10 + $0x200] sm:$0xff]  ;;  %v1213_v50 = vld [vmem:[#allocation10 + $0x438] sm:$0xff]  ;;  %v1212_v51 = vld [vmem:[#allocation10 + $0x430] sm:$0xff] }
 0x126   : > { %v2561_v1 = vld [vmem:[#allocation3 + $0x37] sm:$0xff]  ;;  %1480 = vmatpush.msrb.mxu2 %v1177_v52  ;;  %1518 = vmatpush.msrb.mxu3 %v1196_v55  ;;  %v2000_v52 = vld [vmem:[#allocation3] sm:$0xff] }
 0x127   : > { %v2563_v2 = vld [vmem:[#allocation3 + $0x39] sm:$0xff]  ;;  %855 = vst [vmem:[#allocation3 + $0x50] sm:$0xff] %v2559_v62  ;;  %v789_v4 = vmul.f32 %v2535_v57, %v777_v63  ;;  %1244 = vmatmul.f32.gmra.mxu0 %v2561_v1  ;;  %1364 = vmatmul.f32.gmra.mxu3 %v2561_v1  ;;  %v611_v63 = vadd.f32 %v2526_v41, %v2524_v40  ;;  %v1174_v40 = vld [vmem:[#allocation10 + $0x300] sm:$0xff] }
 0x128   : > { %1326 = vmatmul.f32.gmra.mxu2 %v2563_v2  ;;  %1288 = vmatmul.f32.gmra.mxu1 %v2559_v62 }
 0x129   : > { %v801_v14 = vadd.f32 %v2540_v59, %v789_v4  ;;  %v1221_v4 = vld [vmem:[#allocation10 + $0x478] sm:$0xff]  ;;  %1401 = vmatpush.msra.mxu0 %v1142_v58  ;;  %1481 = vmatpush.msrb.mxu2 %v1176_v60  ;;  %v2666_v58 = vpop.f32.mrf.mxu1 }
 0x12a   : > { %v679_v17 = vpop.f32.mrf.mxu2  ;;  %1519 = vmatpush.msrb.mxu3 %v1195_v61 }
 0x12b   : > { %v762_v18 = vpop.f32.mrf.mxu3  ;;  %v809_v20 = vmax.f32 %v801_v14, 0.0  ;;  %v695_v21 = vadd.f32 %v679_v17, %v605_v12  ;;  %v1220_v14 = vld [vmem:[#allocation10 + $0x470] sm:$0xff]  ;;  %1550 = vmatpush.msrb.mxu0 %v1221_v4  ;;  %1482 = vmatpush.msrb.mxu2 %v1175_v7  ;;  %v1646_v4 = vld [vmem:[#allocation11 + $0x78] sm:$0xff] }
 0x12c   : > { %1520 = vmatpush.msrb.mxu3 %v1194_v8  ;;  %1647 = vmatpush.msrb.mxu1 %v1646_v4  ;;  %v1645_v8 = vld [vmem:[#allocation11 + $0x70] sm:$0xff] }
 0x12d   : > { %v2574_v10 = vmin.f32 %v809_v20, 6.0  ;;  %v778_v11 = vadd.f32 %v762_v18, %v695_v21  ;;  %v1193_v18 = vld [vmem:[#allocation10 + $0x398] sm:$0xff]  ;;  %1551 = vmatpush.msrb.mxu0 %v1220_v14  ;;  %v1192_v20 = vld [vmem:[#allocation10 + $0x390] sm:$0xff]  ;;  %v1219_v21 = vld [vmem:[#allocation10 + $0x468] sm:$0xff]  ;;  %1483 = vmatpush.msrb.mxu2 %v1174_v40 }
 0x12e   : > { %v2576_v24 = vld [vmem:[#allocation3 + $0x4f] sm:$0xff]  ;;  %1521 = vmatpush.msrb.mxu3 %v1193_v18  ;;  %1648 = vmatpush.msrb.mxu1 %v1645_v8 }
 0x12f   : > { %v2578_v25 = vld [vmem:[#allocation3 + $0x51] sm:$0xff]  ;;  %856 = vst [vmem:[#allocation3 + $0x68] sm:$0xff] %v2574_v10  ;;  %v790_v27 = vmul.f32 %v2535_v57, %v778_v11  ;;  %1247 = vmatmul.f32.gmra.mxu0 %v2576_v24  ;;  %1367 = vmatmul.f32.gmra.mxu3 %v2576_v24 }
 0x130   : > { %1329 = vmatmul.f32.gmra.mxu2 %v2578_v25  ;;  %1291 = vmatmul.f32.gmra.mxu1 %v2574_v10  ;;  %v1218_v11 = vld [vmem:[#allocation10 + $0x460] sm:$0xff] }
 0x131   : > { %v802_v37 = vadd.f32 %v2540_v59, %v790_v27  ;;  %1552 = vmatpush.msrb.mxu0 %v1219_v21  ;;  %1522 = vmatpush.msrb.mxu3 %v1192_v20  ;;  %v1641_v20 = vld [vmem:[#allocation11 + $0x50] sm:$0xff] }
 0x132   : > { %v682_v43 = vpop.f32.mrf.mxu2 }
 0x133   : > { %v765_v44 = vpop.f32.mrf.mxu3  ;;  %v810_v46 = vmax.f32 %v802_v37, 0.0  ;;  %v696_v49 = vadd.f32 %v682_v43, %v608_v36  ;;  %1553 = vmatpush.msrb.mxu0 %v1218_v11  ;;  %1523 = vmatpush.msrb.mxu3 %v1191_v28  ;;  %v1638_v28 = vld [vmem:[#allocation11 + $0x38] sm:$0xff] }
 0x135   : > { %v2589_v30 = vmin.f32 %v810_v46, 6.0  ;;  %v779_v31 = vadd.f32 %v765_v44, %v696_v49  ;;  %1524 = vmatpush.msrb.mxu3 %v1190_v47  ;;  %1554 = vmatpush.msrb.mxu0 %v1217_v39  ;;  %v1214_v49 = vld [vmem:[#allocation10 + $0x440] sm:$0xff] }
 0x136   : > { %v2591_v53 = vld [vmem:[#allocation3 + $0x67] sm:$0xff] }
 0x137   : > { %v2593_v54 = vld [vmem:[#allocation3 + $0x69] sm:$0xff]  ;;  %857 = vst [vmem:[#allocation3 + $0x80] sm:$0xff] %v2589_v30  ;;  %v791_v56 = vmul.f32 %v2535_v57, %v779_v31  ;;  %1250 = vmatmul.f32.gmra.mxu0 %v2591_v53  ;;  %1370 = vmatmul.f32.gmra.mxu3 %v2591_v53 }
 0x138   : > { %1332 = vmatmul.f32.gmra.mxu2 %v2593_v54  ;;  %1294 = vmatmul.f32.gmra.mxu1 %v2589_v30  ;;  %v1210_v31 = vld [vmem:[#allocation10 + $0x420] sm:$0xff] }
 0x139   : > { %v803_v3 = vadd.f32 %v2540_v59, %v791_v56  ;;  %1555 = vmatpush.msrb.mxu0 %v1216_v42  ;;  %v1635_v42 = vld [vmem:[#allocation11 + $0x20] sm:$0xff] }
 0x13a   : > { %v685_v5 = vpop.f32.mrf.mxu2 }
 0x13b   : > { %v768_v6 = vpop.f32.mrf.mxu3  ;;  %v811_v9 = vmax.f32 %v803_v3, 0.0  ;;  %v697_v12 = vadd.f32 %v685_v5, %v611_v63 }
 0x13d   : > { %v2604_v15 = vmin.f32 %v811_v9, 6.0  ;;  %v780_v16 = vadd.f32 %v768_v6, %v697_v12  ;;  %v1644_v12 = vld [vmem:[#allocation11 + $0x68] sm:$0xff] }
 0x13e   : > { %v2606_v41 = vld [vmem:[#allocation3 + $0x7f] sm:$0xff]  ;;  %1649 = vmatpush.msrb.mxu1 %v1644_v12 }
 0x13f   : > { %v2608_v17 = vld [vmem:[#allocation3 + $0x81] sm:$0xff]  ;;  %858 = vst [vmem:[#allocation3 + $0x98] sm:$0xff] %v2604_v15  ;;  %v792_v19 = vmul.f32 %v2535_v57, %v780_v16  ;;  %1253 = vmatmul.f32.gmra.mxu0 %v2606_v41  ;;  %1373 = vmatmul.f32.gmra.mxu3 %v2606_v41  ;;  %v1643_v16 = vld [vmem:[#allocation11 + $0x60] sm:$0xff] }
 0x140   : > { %1335 = vmatmul.f32.gmra.mxu2 %v2608_v17  ;;  %1297 = vmatmul.f32.gmra.mxu1 %v2604_v15 }
 0x141   : > { %v804_v23 = vadd.f32 %v2540_v59, %v792_v19  ;;  %1650 = vmatpush.msrb.mxu1 %v1643_v16 }
 0x142   : > { %v688_v26 = vpop.f32.mrf.mxu2 }
 0x143   : > { %v771_v27 = vpop.f32.mrf.mxu3  ;;  %v812_v29 = vmax.f32 %v804_v23, 0.0  ;;  %v698_v32 = vadd.f32 %v688_v26, %v614_v22  ;;  %v1640_v22 = vld [vmem:[#allocation11 + $0x48] sm:$0xff] }
 0x145   : > { %v2619_v33 = vmin.f32 %v812_v29, 6.0  ;;  %v781_v34 = vadd.f32 %v771_v27, %v698_v32  ;;  %v1639_v27 = vld [vmem:[#allocation11 + $0x40] sm:$0xff] }
 0x146   : > { %v867_v36 = vld [vmem:[#allocation3 + $0x97] sm:$0xff] }
 0x147   : > { %v2621_v37 = vld [vmem:[#allocation3 + $0x99] sm:$0xff]  ;;  %859 = vst [vmem:[#allocation3 + $0xb0] sm:$0xff] %v2619_v33  ;;  %v793_v48 = vmul.f32 %v2535_v57, %v781_v34  ;;  %1256 = vmatmul.f32.gmra.mxu0 %v867_v36  ;;  %1376 = vmatmul.f32.gmra.mxu3 %v867_v36 }
 0x148   : > { %1338 = vmatmul.f32.gmra.mxu2 %v2621_v37  ;;  %1300 = vmatmul.f32.gmra.mxu1 %v2619_v33  ;;  %v1215_v57 = vld [vmem:[#allocation10 + $0x448] sm:$0xff] }
 0x149   : > { %v805_v43 = vadd.f32 %v2540_v59, %v793_v48  ;;  %1556 = vmatpush.msrb.mxu0 %v1215_v57 }
 0x14a   : > { %v2669_v60 = vpop.f32.mrf.mxu2 }
 0x14b   : > { %v813_v44 = vmax.f32 %v805_v43, 0.0  ;;  %1557 = vmatpush.msrb.mxu0 %v1214_v49 }
 0x14d   : > { %v821_v0 = vmin.f32 %v813_v44, 6.0  ;;  %1558 = vmatpush.msrb.mxu0 %v1213_v50  ;;  %v1634_v44 = vld [vmem:[#allocation11 + $0x18] sm:$0xff]  ;;  %v1632_v50 = vld [vmem:[#allocation11 + $0x8] sm:$0xff] }
 0x14e   : > { %v868_v45 = vld [vmem:[#allocation3 + $0xaf] sm:$0xff] }
 0x14f   : > { %v2628_v46 = vld [vmem:[#allocation3 + $0xb1] sm:$0xff]  ;;  %860 = vst [vmem:[#allocation3 + $0xc8] sm:$0xff] %v821_v0  ;;  %1259 = vmatmul.f32.gmra.mxu0 %v868_v45  ;;  %1379 = vmatmul.f32.gmra.mxu3 %v868_v45 }
 0x150   : > { %1341 = vmatmul.f32.gmra.mxu2 %v2628_v46  ;;  %1443 = vmatmul.f32.vlgmr.msra.gmra.mxu1 %v2552_v38  ;;  %v1211_v38 = vld [vmem:[#allocation10 + $0x428] sm:$0xff] }
 0x151   : > { %1559 = vmatpush.msrb.mxu0 %v1212_v51  ;;  %v1631_v51 = vld [vmem:[#allocation11] sm:$0xff] }
 0x153   : > { %1560 = vmatpush.msrb.mxu0 %v1211_v38 }
 0x155   : > { %1561 = vmatpush.msrb.mxu0 %v1210_v31 }
 0x156   : > { %v916_v59 = vld [vmem:[#allocation3 + $0xc7] sm:$0xff] }
 0x157   : > { %1402 = vmatmul.f32.vlgmr.msra.gmra.mxu0 %v2544_v13  ;;  %1382 = vmatmul.f32.gmra.mxu3 %v916_v59  ;;  %v1209_v13 = vld [vmem:[#allocation10 + $0x418] sm:$0xff] }
 0x158   : > { %1484 = vmatmul.f32.vlgmr.msrb.gmra.mxu2 %v2561_v1  ;;  %1446 = vmatmul.f32.gmra.mxu1 %v2563_v2  ;;  %v1208_v1 = vld [vmem:[#allocation10 + $0x410] sm:$0xff] }
 0x159   : > { %1562 = vmatpush.msrb.mxu0 %v1209_v13 }
 0x15b   : > { %1563 = vmatpush.msrb.mxu0 %v1208_v1 }
 0x15f   : > { %1405 = vmatmul.f32.gmra.mxu0 %v2550_v35  ;;  %1525 = vmatmul.f32.vlgmr.msrb.gmra.mxu3 %v2550_v35  ;;  %v1207_v35 = vld [vmem:[#allocation10 + $0x408] sm:$0xff] }
 0x160   : > { %1487 = vmatmul.f32.gmra.mxu2 %v2576_v24  ;;  %1449 = vmatmul.f32.gmra.mxu1 %v2578_v25  ;;  %v1206_v24 = vld [vmem:[#allocation10 + $0x400] sm:$0xff] }
 0x161   : > { %1564 = vmatpush.msrb.mxu0 %v1207_v35 }
 0x163   : > { %1565 = vmatpush.msrb.mxu0 %v1206_v24 }
 0x167   : > { %1408 = vmatmul.f32.gmra.mxu0 %v2559_v62  ;;  %1528 = vmatmul.f32.gmra.mxu3 %v2559_v62  ;;  %v948_v62 = vld [vmem:[#allocation3 + $0xc9] sm:$0xff] }
 0x168   : > { %1490 = vmatmul.f32.gmra.mxu2 %v2591_v53  ;;  %1452 = vmatmul.f32.gmra.mxu1 %v2593_v54 }
 0x16f   : > { %1411 = vmatmul.f32.gmra.mxu0 %v2574_v10  ;;  %1531 = vmatmul.f32.gmra.mxu3 %v2574_v10  ;;  %v965_v10 = vld [vmem:[#allocation3 + $0xdf] sm:$0xff] }
 0x170   : > { %1493 = vmatmul.f32.gmra.mxu2 %v2606_v41  ;;  %1455 = vmatmul.f32.gmra.mxu1 %v2608_v17 }
 0x177   : > { %1414 = vmatmul.f32.gmra.mxu0 %v2589_v30  ;;  %1534 = vmatmul.f32.gmra.mxu3 %v2589_v30  ;;  %v2655_v30 = vpop.f32.mrf.mxu0 }
 0x178   : > { %1496 = vmatmul.f32.gmra.mxu2 %v867_v36  ;;  %1458 = vmatmul.f32.gmra.mxu1 %v2621_v37  ;;  %v1637_v36 = vld [vmem:[#allocation11 + $0x30] sm:$0xff]  ;;  %v1281_v1 = vadd.f32 %v2666_v58, %v2655_v30 }
 0x17a   : > { %v1322_v24 = vadd.f32 %v2669_v60, %v1281_v1 }
 0x17f   : > { %1417 = vmatmul.f32.gmra.mxu0 %v2604_v15  ;;  %1537 = vmatmul.f32.gmra.mxu3 %v2604_v15  ;;  %v997_v15 = vld [vmem:[#allocation3 + $0xe1] sm:$0xff] }
 0x180   : > { %1499 = vmatmul.f32.gmra.mxu2 %v868_v45  ;;  %1461 = vmatmul.f32.gmra.mxu1 %v2628_v46  ;;  %v1633_v45 = vld [vmem:[#allocation11 + $0x10] sm:$0xff] }
 0x187   : > { %1420 = vmatmul.f32.gmra.mxu0 %v2619_v33  ;;  %1540 = vmatmul.f32.gmra.mxu3 %v2619_v33 }
 0x188   : > { %1502 = vmatmul.f32.gmra.mxu2 %v916_v59  ;;  %1464 = vmatmul.f32.gmra.mxu1 %v948_v62 }
 0x18f   : > { %1423 = vmatmul.f32.gmra.mxu0 %v821_v0  ;;  %1543 = vmatmul.f32.gmra.mxu3 %v821_v0 }
 0x190   : > { %1505 = vmatmul.f32.gmra.mxu2 %v965_v10 }
 0x194   : > { %v2676_v63 = vpop.f32.mrf.mxu1 }
 0x197   : > { %1566 = vmatmul.f32.vlgmr.msrb.gmra.mxu0 %v2563_v2  ;;  %1546 = vmatmul.f32.gmra.mxu3 %v2000_v52 }
 0x19c   : > { %v2658_v53 = vpop.f32.mrf.mxu0 }
 0x19d   : > { %v2685_v5 = vpop.f32.mrf.mxu1 }
 0x19f   : > { %1569 = vmatmul.f32.gmra.mxu0 %v2578_v25 }
 0x1a2   : > { %v2671_v61 = vpop.f32.mrf.mxu3 }
 0x1a3   : > { %v2678_v25 = vpop.f32.mrf.mxu2 }
 0x1a4   : > { %v2661_v55 = vpop.f32.mrf.mxu0 }
 0x1a5   : > { %v2695_v40 = vpop.f32.mrf.mxu1 }
 0x1a7   : > { %1572 = vmatmul.f32.gmra.mxu0 %v2593_v54 }
 0x1aa   : > { %v2680_v3 = vpop.f32.mrf.mxu3 }
 0x1ab   : > { %v2687_v6 = vpop.f32.mrf.mxu2 }
 0x1ac   : > { %v2664_v56 = vpop.f32.mrf.mxu0 }
 0x1ad   : > { %v2701_v21 = vpop.f32.mrf.mxu1 }
 0x1af   : > { %1575 = vmatmul.f32.gmra.mxu0 %v2608_v17  ;;  %v1642_v17 = vld [vmem:[#allocation11 + $0x58] sm:$0xff] }
 0x1b0   : > { %1651 = vmatpush.msrb.mxu1 %v1642_v17 }
 0x1b2   : > { %v2691_v9 = vpop.f32.mrf.mxu3  ;;  %1652 = vmatpush.msrb.mxu1 %v1641_v20 }
 0x1b3   : > { %v2697_v41 = vpop.f32.mrf.mxu2 }
 0x1b4   : > { %v2673_v2 = vpop.f32.mrf.mxu0  ;;  %1653 = vmatpush.msrb.mxu1 %v1640_v22 }
 0x1b5   : > { %v2707_v29 = vpop.f32.mrf.mxu1 }
 0x1b6   : > { %1654 = vmatpush.msrb.mxu1 %v1639_v27 }
 0x1b7   : > { %1578 = vmatmul.f32.gmra.mxu0 %v2621_v37  ;;  %v1636_v37 = vld [vmem:[#allocation11 + $0x28] sm:$0xff] }
 0x1b8   : > { %1655 = vmatpush.msrb.mxu1 %v1638_v28  ;;  %v1287_v28 = vadd.f32 %v2685_v5, %v2661_v55 }
 0x1ba   : > { %v2699_v18 = vpop.f32.mrf.mxu3  ;;  %1656 = vmatpush.msrb.mxu1 %v1637_v36 }
 0x1bb   : > { %v2703_v23 = vpop.f32.mrf.mxu2 }
 0x1bc   : > { %v2682_v54 = vpop.f32.mrf.mxu0  ;;  %1657 = vmatpush.msrb.mxu1 %v1636_v37 }
 0x1bd   : > { %v2713_v47 = vpop.f32.mrf.mxu1 }
 0x1be   : > { %1658 = vmatpush.msrb.mxu1 %v1635_v42 }
 0x1bf   : > { %1581 = vmatmul.f32.gmra.mxu0 %v2628_v46 }
 0x1c0   : > { %1659 = vmatpush.msrb.mxu1 %v1634_v44 }
 0x1c2   : > { %v2705_v11 = vpop.f32.mrf.mxu3  ;;  %1660 = vmatpush.msrb.mxu1 %v1633_v45 }
 0x1c3   : > { %v2709_v32 = vpop.f32.mrf.mxu2 }
 0x1c4   : > { %v2689_v7 = vpop.f32.mrf.mxu0  ;;  %1661 = vmatpush.msrb.mxu1 %v1632_v50 }
 0x1c5   : > { %v2723_v46 = vpop.f32.mrf.mxu1 }
 0x1c6   : > { %1662 = vmatpush.msrb.mxu1 %v1631_v51  ;;  %v1290_v51 = vadd.f32 %v2695_v40, %v2664_v56 }
 0x1c7   : > { %1584 = vmatmul.f32.gmra.mxu0 %v948_v62  ;;  %v1363_v62 = vadd.f32 %v2671_v61, %v1322_v24  ;;  %v2746_v61 = vld [vmem:[%s2856_s6] ss:$0 sm:$0xff] }
 0x1ca   : > { %v2711_v33 = vpop.f32.mrf.mxu3 }
 0x1cb   : > { %v2715_v48 = vpop.f32.mrf.mxu2 }
 0x1cc   : > { %v2693_v14 = vpop.f32.mrf.mxu0 }
 0x1cd   : > { %v1444_v38 = vpop.f32.mrf.mxu1 }
 0x1cf   : > { %1587 = vmatmul.f32.gmra.mxu0 %v997_v15  ;;  %v1284_v15 = vadd.f32 %v2676_v63, %v2658_v53  ;;  %v2753_v63 = vld [vmem:[%s2857_s7] ss:$0 sm:$0xff] }
 0x1d1   : > { %v1325_v16 = vadd.f32 %v2678_v25, %v1284_v15  ;;  %v1293_v15 = vadd.f32 %v2701_v21, %v2673_v2 }
 0x1d2   : > { %v2719_v43 = vpop.f32.mrf.mxu3 }
 0x1d3   : > { %v2725_v57 = vpop.f32.mrf.mxu2  ;;  %v1366_v30 = vadd.f32 %v2680_v3, %v1325_v16  ;;  %v1328_v3 = vadd.f32 %v2687_v6, %v1287_v28  ;;  %v1331_v6 = vadd.f32 %v2697_v41, %v1290_v51 }
 0x1d4   : > { %v1403_v19 = vpop.f32.mrf.mxu0 }
 0x1d5   : > { %v1447_v10 = vpop.f32.mrf.mxu1  ;;  %v1404_v4 = vadd.f32 %v1403_v19, %v1363_v62  ;;  %v1369_v37 = vadd.f32 %v2691_v9, %v1328_v3 }
 0x1d7   : > { %v1445_v17 = vadd.f32 %v1444_v38, %v1404_v4 }
 0x1da   : > { %v2727_v49 = vpop.f32.mrf.mxu3 }
 0x1db   : > { %v1485_v31 = vpop.f32.mrf.mxu2 }
 0x1dc   : > { %v1406_v26 = vpop.f32.mrf.mxu0  ;;  %v1486_v58 = vadd.f32 %v1485_v31, %v1445_v17  ;;  %v1334_v17 = vadd.f32 %v2703_v23, %v1293_v15  ;;  %v1296_v23 = vadd.f32 %v2707_v29, %v2682_v54 }
 0x1dd   : > { %v1407_v20 = vadd.f32 %v1406_v26, %v1366_v30  ;;  %v1450_v60 = vpop.f32.mrf.mxu1 }
 0x1de   : > { %v1337_v3 = vadd.f32 %v2709_v32, %v1296_v23  ;;  %v1299_v32 = vadd.f32 %v2713_v47, %v2689_v7  ;;  %v1302_v47 = vadd.f32 %v2723_v46, %v2693_v14 }
 0x1df   : > { %v1448_v26 = vadd.f32 %v1447_v10, %v1407_v20  ;;  %v1372_v10 = vadd.f32 %v2699_v18, %v1331_v6 }
 0x1e2   : > { %v1526_v13 = vpop.f32.mrf.mxu3 }
 0x1e3   : > { %v1488_v52 = vpop.f32.mrf.mxu2  ;;  %v1527_v22 = vadd.f32 %v1526_v13, %v1486_v58 }
 0x1e4   : > { %v1409_v34 = vpop.f32.mrf.mxu0  ;;  %v1489_v42 = vadd.f32 %v1488_v52, %v1448_v26 }
 0x1e5   : > { %v1410_v45 = vadd.f32 %v1409_v34, %v1369_v37  ;;  %v1453_v38 = vpop.f32.mrf.mxu1 }
 0x1e7   : > { %v1451_v24 = vadd.f32 %v1450_v60, %v1410_v45 }
 0x1ea   : > { %v1529_v8 = vpop.f32.mrf.mxu3 }
 0x1eb   : > { %v1491_v19 = vpop.f32.mrf.mxu2  ;;  %v1530_v50 = vadd.f32 %v1529_v8, %v1489_v42 }
 0x1ec   : > { %v2717_v39 = vpop.f32.mrf.mxu0  ;;  %v1492_v34 = vadd.f32 %v1491_v19, %v1451_v24 }
 0x1ed   : > { %v1413_v4 = vadd.f32 %v2717_v39, %v1372_v10  ;;  %v1456_v58 = vpop.f32.mrf.mxu1 }
 0x1ef   : > { %v1454_v30 = vadd.f32 %v1453_v38, %v1413_v4  ;;  %v1340_v38 = vadd.f32 %v2715_v48, %v1299_v32  ;;  %v1343_v4 = vadd.f32 %v2725_v57, %v1302_v47 }
 0x1f2   : > { %v1532_v25 = vpop.f32.mrf.mxu3 }
 0x1f3   : > { %v1494_v1 = vpop.f32.mrf.mxu2  ;;  %v1533_v8 = vadd.f32 %v1532_v25, %v1492_v34 }
 0x1f4   : > { %v2721_v0 = vpop.f32.mrf.mxu0  ;;  %v1495_v60 = vadd.f32 %v1494_v1, %v1454_v30 }
 0x1f5   : > { %v1459_v42 = vpop.f32.mrf.mxu1 }
 0x1fa   : > { %v1535_v9 = vpop.f32.mrf.mxu3 }
 0x1fb   : > { %v1497_v18 = vpop.f32.mrf.mxu2  ;;  %v1536_v28 = vadd.f32 %v1535_v9, %v1495_v60 }
 0x1fc   : > { %v2729_v59 = vpop.f32.mrf.mxu0 }
 0x1fd   : > { %v1462_v24 = vpop.f32.mrf.mxu1 }
 0x202   : > { %v1538_v19 = vpop.f32.mrf.mxu3 }
 0x204   : > { %v2733_v35 = vpop.f32.mrf.mxu0 }
 0x205   : > { %v1465_v30 = vpop.f32.mrf.mxu1 }
 0x20a   : > { %v1541_v54 = vpop.f32.mrf.mxu3 }
 0x20c   : > { %v2737_v12 = vpop.f32.mrf.mxu0 }
 0x214   : > { %v1567_v27 = vpop.f32.mrf.mxu0 }
 0x215   : > { %v1568_v53 = vadd.f32 %v1567_v27, %v1527_v22  ;;  %v1375_v22 = vadd.f32 %v2705_v11, %v1334_v17  ;;  %v1378_v11 = vadd.f32 %v2711_v33, %v1337_v3 }
 0x217   : > { %v1595_v36 = vmul.f32 %v2746_v61, %v1568_v53  ;;  %v1416_v27 = vadd.f32 %v2721_v0, %v1375_v22  ;;  %v1419_v45 = vadd.f32 %v2729_v59, %v1378_v11 }
 0x219   : > { %v1607_v44 = vadd.f32 %v2753_v63, %v1595_v36  ;;  %v1457_v26 = vadd.f32 %v1456_v58, %v1416_v27 }
 0x21b   : > { %v1615_v55 = vmax.f32 %v1607_v44, 0.0  ;;  %v1498_v37 = vadd.f32 %v1497_v18, %v1457_v26  ;;  %v1500_v44 = vpop.f32.mrf.mxu2 }
 0x21c   : > { %v1570_v5 = vpop.f32.mrf.mxu0 }
 0x21d   : > { %v1623_v31 = vmin.f32 %v1615_v55, 6.0  ;;  %v1571_v13 = vadd.f32 %v1570_v5, %v1530_v50  ;;  %v1539_v50 = vadd.f32 %v1538_v19, %v1498_v37 }
 0x21f   : > { %v1596_v62 = vmul.f32 %v2746_v61, %v1571_v13  ;;  %1663 = vmatmul.f32.vlgmr.msrb.gmra.mxu1 %v1623_v31  ;;  %v1460_v31 = vadd.f32 %v1459_v42, %v1419_v45  ;;  %v1381_v13 = vadd.f32 %v2719_v43, %v1340_v38 }
 0x221   : > { %v1608_v52 = vadd.f32 %v2753_v63, %v1596_v62  ;;  %v1501_v1 = vadd.f32 %v1500_v44, %v1460_v31  ;;  %v1422_v6 = vadd.f32 %v2733_v35, %v1381_v13 }
 0x223   : > { %v1616_v56 = vmax.f32 %v1608_v52, 0.0  ;;  %v1542_v62 = vadd.f32 %v1541_v54, %v1501_v1  ;;  %v1503_v10 = vpop.f32.mrf.mxu2  ;;  %v1544_v52 = vpop.f32.mrf.mxu3 }
 0x224   : > { %v1573_v40 = vpop.f32.mrf.mxu0 }
 0x225   : > { %v1574_v16 = vadd.f32 %v1573_v40, %v1533_v8  ;;  %v1624_v41 = vmin.f32 %v1616_v56, 6.0  ;;  %v1463_v8 = vadd.f32 %v1462_v24, %v1422_v6  ;;  %v1384_v56 = vadd.f32 %v2727_v49, %v1343_v4 }
 0x227   : > { %v1597_v20 = vmul.f32 %v2746_v61, %v1574_v16  ;;  %1666 = vmatmul.f32.gmra.mxu1 %v1624_v41  ;;  %v1504_v35 = vadd.f32 %v1503_v10, %v1463_v8  ;;  %v1425_v15 = vadd.f32 %v2737_v12, %v1384_v56 }
 0x229   : > { %v1609_v39 = vadd.f32 %v2753_v63, %v1597_v20  ;;  %v1545_v16 = vadd.f32 %v1544_v52, %v1504_v35  ;;  %v1466_v20 = vadd.f32 %v1465_v30, %v1425_v15 }
 0x22b   : > { %v1617_v2 = vmax.f32 %v1609_v39, 0.0  ;;  %v1506_v58 = vpop.f32.mrf.mxu2  ;;  %v1547_v18 = vpop.f32.mrf.mxu3 }
 0x22c   : > { %v1576_v21 = vpop.f32.mrf.mxu0  ;;  %v1507_v22 = vadd.f32 %v1506_v58, %v1466_v20 }
 0x22d   : > { %v1577_v53 = vadd.f32 %v1576_v21, %v1536_v28  ;;  %v1625_v25 = vmin.f32 %v1617_v2, 6.0 }
 0x22e   : > { %v1548_v60 = vadd.f32 %v1547_v18, %v1507_v22 }
 0x22f   : > { %v1598_v36 = vmul.f32 %v2746_v61, %v1577_v53  ;;  %1669 = vmatmul.f32.gmra.mxu1 %v1625_v25  ;;  %v1998_v53 = vld [vmem:[%s2858_s8] ss:$0 sm:$0xff] }
 0x230   : > { %v1999_v25 = vld [vmem:[%s2859_s9] ss:$0 sm:$0xff] }
 0x231   : > { %v1610_v0 = vadd.f32 %v2753_v63, %v1598_v36 }
 0x233   : > { %v1618_v55 = vmax.f32 %v1610_v0, 0.0 }
 0x234   : > { %v1579_v29 = vpop.f32.mrf.mxu0 }
 0x235   : > { %v1580_v5 = vadd.f32 %v1579_v29, %v1539_v50  ;;  %v1626_v51 = vmin.f32 %v1618_v55, 6.0 }
 0x237   : > { %v1599_v33 = vmul.f32 %v2746_v61, %v1580_v5  ;;  %1672 = vmatmul.f32.gmra.mxu1 %v1626_v51 }
 0x239   : > { %v1611_v59 = vadd.f32 %v2753_v63, %v1599_v33 }
 0x23b   : > { %v1619_v9 = vmax.f32 %v1611_v59, 0.0 }
 0x23c   : > { %v1582_v7 = vpop.f32.mrf.mxu0 }
 0x23d   : > { %v1583_v48 = vadd.f32 %v1582_v7, %v1542_v62  ;;  %v1627_v34 = vmin.f32 %v1619_v9, 6.0 }
 0x23f   : > { %v1600_v43 = vmul.f32 %v2746_v61, %v1583_v48  ;;  %1675 = vmatmul.f32.gmra.mxu1 %v1627_v34 }
 0x241   : > { %v1612_v40 = vadd.f32 %v2753_v63, %v1600_v43 }
 0x243   : > { %v1620_v41 = vmax.f32 %v1612_v40, 0.0 }
 0x244   : > { %v1585_v17 = vpop.f32.mrf.mxu0 }
 0x245   : > { %v1586_v14 = vadd.f32 %v1585_v17, %v1545_v16  ;;  %v1628_v46 = vmin.f32 %v1620_v41, 6.0 }
 0x247   : > { %v1601_v57 = vmul.f32 %v2746_v61, %v1586_v14  ;;  %1678 = vmatmul.f32.gmra.mxu1 %v1628_v46 }
 0x249   : > { %v1613_v49 = vadd.f32 %v2753_v63, %v1601_v57 }
 0x24b   : > { %v1621_v39 = vmax.f32 %v1613_v49, 0.0 }
 0x24c   : > { %v1588_v19 = vpop.f32.mrf.mxu0 }
 0x24d   : > { %v1589_v27 = vadd.f32 %v1588_v19, %v1548_v60  ;;  %v1629_v12 = vmin.f32 %v1621_v39, 6.0 }
 0x24f   : > { %v1602_v28 = vmul.f32 %v2746_v61, %v1589_v27  ;;  %1681 = vmatmul.f32.gmra.mxu1 %v1629_v12 }
 0x251   : > { %v1614_v2 = vadd.f32 %v2753_v63, %v1602_v28 }
 0x253   : > { %v1622_v21 = vmax.f32 %v1614_v2, 0.0 }
 0x255   : > { %v1630_v23 = vmin.f32 %v1622_v21, 6.0 }
 0x257   : > { %1684 = vmatmul.f32.gmra.mxu1 %v1630_v23 }
 0x29c   : > { %v1664_v3 = vpop.f32.mrf.mxu1 }
 0x29d   : > { %v1692_v26 = vmul.f32 %v1998_v53, %v1664_v3 }
 0x29f   : > { %v1704_v36 = vadd.f32 %v1999_v25, %v1692_v26 }
 0x2a1   : > { %v1712_v11 = vmax.f32 %v1704_v36, 0.0 }
 0x2a3   : > { %v1720_v37 = vmin.f32 %v1712_v11, 6.0 }
 0x2a4   : > { %v1667_v61 = vpop.f32.mrf.mxu1 }
 0x2a5   : > { %1728 = vst [vmem:[%s2806_s2] sm:$0xff] %v1720_v37  ;;  %v1693_v63 = vmul.f32 %v1998_v53, %v1667_v61 }
 0x2a7   : > { %v1705_v42 = vadd.f32 %v1999_v25, %v1693_v63 }
 0x2a9   : > { %v1713_v0 = vmax.f32 %v1705_v42, 0.0 }
 0x2ab   : > { %v1721_v44 = vmin.f32 %v1713_v0, 6.0 }
 0x2ac   : > { %v1670_v45 = vpop.f32.mrf.mxu1 }
 0x2ad   : > { %1729 = vst [vmem:[%s2806_s2 + $0x8] sm:$0xff] %v1721_v44  ;;  %v1694_v50 = vmul.f32 %v1998_v53, %v1670_v45 }
 0x2af   : > { %v1706_v55 = vadd.f32 %v1999_v25, %v1694_v50 }
 0x2b1   : > { %v1714_v54 = vmax.f32 %v1706_v55, 0.0 }
 0x2b3   : > { %v1722_v29 = vmin.f32 %v1714_v54, 6.0 }
 0x2b4   : > { %v1673_v32 = vpop.f32.mrf.mxu1 }
 0x2b5   : > { %1730 = vst [vmem:[%s2806_s2 + $0x10] sm:$0xff] %v1722_v29  ;;  %v1695_v5 = vmul.f32 %v1998_v53, %v1673_v32 }
 0x2b7   : > { %v1707_v51 = vadd.f32 %v1999_v25, %v1695_v5 }
 0x2b9   : > { %v1715_v38 = vmax.f32 %v1707_v51, 0.0 }
 0x2bb   : > { %v1723_v31 = vmin.f32 %v1715_v38, 6.0 }
 0x2bc   : > { %v1676_v33 = vpop.f32.mrf.mxu1 }
 0x2bd   : > { %1731 = vst [vmem:[%s2806_s2 + $0x18] sm:$0xff] %v1723_v31  ;;  %v1696_v13 = vmul.f32 %v1998_v53, %v1676_v33 }
 0x2bf   : > { %v1708_v1 = vadd.f32 %v1999_v25, %v1696_v13 }
 0x2c1   : > { %v1716_v59 = vmax.f32 %v1708_v1, 0.0 }
 0x2c3   : > { %v1724_v6 = vmin.f32 %v1716_v59, 6.0 }
 0x2c4   : > { %v1679_v24 = vpop.f32.mrf.mxu1 }
 0x2c5   : > { %1732 = vst [vmem:[%s2806_s2 + $0x20] sm:$0xff] %v1724_v6  ;;  %v1697_v62 = vmul.f32 %v1998_v53, %v1679_v24 }
 0x2c7   : > { %v1709_v9 = vadd.f32 %v1999_v25, %v1697_v62 }
 0x2c9   : > { %v1717_v10 = vmax.f32 %v1709_v9, 0.0 }
 0x2cb   : > { %v1725_v7 = vmin.f32 %v1717_v10, 6.0 }
 0x2cc   : > { %v1682_v47 = vpop.f32.mrf.mxu1 }
 0x2cd   : > { %1733 = vst [vmem:[%s2806_s2 + $0x28] sm:$0xff] %v1725_v7  ;;  %v1698_v48 = vmul.f32 %v1998_v53, %v1682_v47 }
 0x2cf   : > { %v1710_v34 = vadd.f32 %v1999_v25, %v1698_v48 }
 0x2d1   : > { %v1718_v52 = vmax.f32 %v1710_v34, 0.0 }
 0x2d3   : > { %v1726_v4 = vmin.f32 %v1718_v52, 6.0 }
 0x2d4   : > { %v1685_v8 = vpop.f32.mrf.mxu1 }
 0x2d5   : > { %1734 = vst [vmem:[%s2806_s2 + $0x30] sm:$0xff] %v1726_v4  ;;  %v1699_v43 = vmul.f32 %v1998_v53, %v1685_v8 }
 0x2d7   : > { %v1711_v56 = vadd.f32 %v1999_v25, %v1699_v43 }
 0x2d9   : > { %v1719_v35 = vmax.f32 %v1711_v56, 0.0 }
 0x2db   : > { %v1727_v40 = vmin.f32 %v1719_v35, 6.0 }
 0x2dd   : > { %1735 = vst [vmem:[%s2806_s2 + $0x38] sm:$0xff] %v1727_v40 }
 0x2de   : > { %2148 = shalt.err (!%p2145_p10)
}
 0x2df   : > { %s2203_s1 = smov 128   ;;  %s2204_s2 = smov 8  }
 0x2e0   : > { %1926 = dma.vmem_to_hbm [thread:$0]  (%p2351_p3), %s1750_s12, 1024, %s1752_s26, %s1737_s22, %s2203_s1, %s2203_s1, %s2204_s2  }
 0x2e1 PF: > { %s1766_s3 = sand.u32 1, %s2183_s13   ;;  %p2878_p12 = scmp.ge.s32.totalorder %s2195_s16, 2 }
 0x2e2   : > { %s1767_s19 = scalar_lea.sflag [#allocation7], %s1766_s3 }
 0x2e3   : > { %p1943_p13 = pnand %p2878_p12, %p2295_p6 }
 0x2e5   : > { %p1944_p0 = pneg %p1943_p13 }
 0x2e7   : > { %2178 = dma.done.wait (%p1944_p0), %s1767_s19, 1024  }
 0x2e8   : > { %2180 = vsyncadd (%p1944_p0), %s1767_s19, 4294966272  ;;  %s2879_s24 = sld [smem:[#allocation18_spill]]  ;;  %p25_p5 = scmp.ge.s32.totalorder %s2333_s29, 4  }
 0x2e9   : > { %s2880_s13 = smov %s2187_s14  ;;  %s2881_s14 = smov %s2191_s15 }
 0x2ea   : > { %s2883_s16 = smov %s2333_s29  ;;  %27 = sbr.rel (!%p25_p5) target bundleno = 11 (0xb), region = 120 }
 0x2ee   : > { %s2882_s15 = smov %s2879_s24 }
 0x2ef   :  { %1773 = vsyncpa [#allocation6], 1 }
 0x2f0   :  { %1775 = vsyncpa [#allocation6 + $0x1], 1 }
 0x2f1   :  { %1776 = vsyncpa [#allocation9], 1 }
 0x2f2   :  { %1777 = vsyncpa [#allocation12], 1 }
 0x2f3   :  { %1778 = vsyncpa [#allocation7], 1 }
 0x2f4   :  { %1780 = vsyncpa [#allocation7 + $0x1], 1 }

</bundles_post_ra>
